<compile_context>
chip_gen: v7x
topology: tpu7x:2x2x1
jax: 0.10.0
libtpu: 0.0.40
codegen_flags: <defaults>
</compile_context>

<pallas_src>
import functools

import jax
import jax.numpy as jnp
from jax import lax
from jax.experimental import pallas as pl
from jax.experimental.pallas import tpu as pltpu

NEG_SLOPE = 0.01  # nn.LeakyReLU default
LANE = 128


def convresnet_kernel(x_ref, w_ref, b_ref, o_ref, *, fuse_taps):
    # x_ref: (Bt, L, Cw)   activation block (channel-last)
    # w_ref: (NL, K*Cw, Cw) if fuse_taps else (NL, K, Cw, Cw)   (bf16)
    # b_ref: (NL, 1, Cw)   f32
    # o_ref: (Bt, L, Cw)
    Bt, L, Cw = x_ref.shape
    num_layers = b_ref.shape[0]
    ksize = (w_ref.shape[1] // Cw) if fuse_taps else w_ref.shape[1]
    pad = ksize // 2
    mm_dtype = w_ref.dtype
    M = Bt * L

    # Hoisted per-batch-local row index (single iota for the whole kernel); each
    # tap's boundary mask is one compare at use site, so no persistent boolean
    # slabs are held live across the unrolled layers.
    local = lax.broadcasted_iota(jnp.int32, (Bt, L, Cw), 1).reshape(M, Cw)

    h = x_ref[...].astype(jnp.float32).reshape(M, Cw)   # running activation, f32

    for layer in range(num_layers):
        # Shift the layer INPUT once per tap ('same' zero padding, per batch
        # element); cast each tap to bf16 individually (no f32 concat slab).
        taps = []
        for k in range(ksize):
            d = k - pad
            if d == 0:
                t = h
            else:
                rolled = pltpu.roll(h, shift=(-d) % M, axis=0)   # rolled[r] = h[r + d]
                if d > 0:
                    t = jnp.where(local < L - d, rolled, 0.0)    # rows l >= L-d invalid
                else:
                    t = jnp.where(local >= -d, rolled, 0.0)      # rows l < -d invalid
            taps.append(t.astype(mm_dtype))

        if fuse_taps:
            # One fused MXU matmul per layer: (M, K*Cw) @ (K*Cw, Cw), f32 accumulate.
            h_cat = jnp.concatenate(taps, axis=1)
            y = jnp.dot(h_cat, w_ref[layer], preferred_element_type=jnp.float32)
        else:
            # Small / lane-unaligned Cw: per-tap matmuls, no (M, K*Cw) slab.
            y = jnp.dot(taps[0], w_ref[layer, 0], preferred_element_type=jnp.float32)
            for k in range(1, ksize):
                y = y + jnp.dot(taps[k], w_ref[layer, k],
                                preferred_element_type=jnp.float32)

        y = y + b_ref[layer]                  # (1, Cw) broadcasts over rows, f32
        # TODO(synk): Dropout is identity in eval mode; training-mode dropout omitted.
        y = jnp.maximum(y, NEG_SLOPE * y)     # LeakyReLU
        h = h + y                             # residual

    o_ref[...] = h.reshape(Bt, L, Cw).astype(o_ref.dtype)


def _pack_params(weights, biases, Cw, fuse, mm_dtype):
    """Pack torch-layout (C_out, C_in, K) convs into per-tap (C_in, C_out) slabs."""
    C = weights[0].shape[0]
    K = weights[0].shape[-1]
    w_layers = []
    for W in weights:
        taps = []
        for k in range(K):
            wk = jnp.transpose(W[:, :, k])                   # (C_in, C_out)
            if Cw != C:
                wk = jnp.pad(wk, ((0, Cw - C), (0, Cw - C)))
            taps.append(wk)
        if fuse:
            w_layers.append(jnp.concatenate(taps, axis=0))   # (K*Cw, Cw), tap-major
        else:
            w_layers.append(jnp.stack(taps, axis=0))         # (K, Cw, Cw)
    w_cat = jnp.stack(w_layers, axis=0).astype(mm_dtype)
    b_cat = jnp.stack(
        [jnp.pad(b, (0, Cw - C)) if Cw != C else b for b in biases],
        axis=0)[:, None, :].astype(jnp.float32)              # (NL, 1, Cw)
    return w_cat, b_cat


@functools.partial(
    jax.jit,
    static_argnames=("Bt", "fuse", "vmem_limit", "single_buffer_weights"))
def _convresnet_call(x_w, w_cat, b_cat, *, Bt, fuse, vmem_limit,
                     single_buffer_weights):
    B, L, Cw = x_w.shape
    NL = b_cat.shape[0]
    K = (w_cat.shape[1] // Cw) if fuse else w_cat.shape[1]

    # Constant-index weight/bias blocks stay VMEM-resident across the grid;
    # single-buffer them (one copy instead of two) when supported.
    res_kw = {"pipeline_mode": pl.Buffered(1)} if single_buffer_weights else {}
    w_ndim = w_cat.ndim
    in_specs = [
        pl.BlockSpec((Bt, L, Cw), lambda b: (b, 0, 0)),
        pl.BlockSpec(tuple(w_cat.shape), lambda b, n=w_ndim: (0,) * n, **res_kw),
        pl.BlockSpec(tuple(b_cat.shape), lambda b: (0, 0, 0), **res_kw),
    ]

    cost = pl.CostEstimate(
        flops=2 * B * L * NL * K * Cw * Cw,
        transcendentals=0,
        bytes_accessed=(2 * x_w.size * x_w.dtype.itemsize
                        + w_cat.size * w_cat.dtype.itemsize
                        + b_cat.size * b_cat.dtype.itemsize),
    )

    return pl.pallas_call(
        functools.partial(convresnet_kernel, fuse_taps=fuse),
        out_shape=jax.ShapeDtypeStruct((B, L, Cw), x_w.dtype),
        grid_spec=pltpu.PrefetchScalarGridSpec(
            num_scalar_prefetch=0,
            grid=(B // Bt,),
            in_specs=in_specs,
            out_specs=pl.BlockSpec((Bt, L, Cw), lambda b: (b, 0, 0)),
        ),
        compiler_params=pltpu.CompilerParams(
            dimension_semantics=("parallel",),
            vmem_limit_bytes=vmem_limit,
        ),
        cost_estimate=cost,
    )(x_w, w_cat, b_cat)


def convresnet_pallas(x, weights, biases, matmul_dtype=jnp.bfloat16,
                      target_rows=512):
    """x: (B, L, C) f32; weights: list of torch-layout (C_out, C_in, K); biases: (C,)."""
    B, L, C = x.shape
    K = weights[0].shape[-1]
    NL = len(weights)
    assert K % 2 == 1, "tap packing assumes an odd kernel with 'same' (K//2) padding"

    # Channel width used in HBM and in-kernel.
    if C % LANE == 0:
        Cw, fuse = C, True          # naturally lane-dense -> fused-tap matmul
    elif C < LANE:
        Cw, fuse = C, False         # keep HBM at C (no 4x pad traffic); per-tap matmuls
    else:
        Cw, fuse = pl.cdiv(C, LANE) * LANE, True   # pad up to lane multiple (<2x)

    w_cat, b_cat = _pack_params(weights, biases, Cw, fuse, matmul_dtype)
    x_w = x if Cw == C else jnp.pad(x, ((0, 0), (0, 0), (0, Cw - C)))

    # Rows per grid step: aim for M = Bt*L >= target_rows (multiples of 256 fill
    # the v6e/v7x MXU M dimension), capped by an explicit VMEM byte budget.
    def vmem_bytes(bt):
        m = bt * L
        io = 2 * 2 * m * Cw * 4                          # in + out blocks, double-buffered
        wts = w_cat.size * w_cat.dtype.itemsize + 2 * b_cat.size * 4
        inter = 4 * m * Cw * 4 + m * K * Cw * 2          # h / y / iota+mask + bf16 taps
        return io + wts + inter

    budget = 24 * 2**20                                  # conservative for v7x (64 MiB VMEM)
    bt_cap = max(1, pl.cdiv(target_rows, L))
    while bt_cap > 1 and vmem_bytes(bt_cap) > budget:
        bt_cap -= 1
    Bt = max(d for d in range(1, B + 1) if B % d == 0 and d <= bt_cap)
    # TODO(synk): for very large L, add an L-tiling grid axis with a
    # num_layers*(K//2)-row halo instead of whole-L blocks.

    vmem_limit = int(min(48 * 2**20, max(32 * 2**20, 2 * vmem_bytes(Bt))))

    kw = dict(Bt=Bt, fuse=fuse, vmem_limit=vmem_limit)
    try:
        out = jax.block_until_ready(
            _convresnet_call(x_w, w_cat, b_cat, single_buffer_weights=True, **kw))
    except Exception:
        # pl.Buffered(1) (single-buffered resident weights) not supported by this
        # jax/libtpu build -> retry with default double buffering.
        out = _convresnet_call(x_w, w_cat, b_cat, single_buffer_weights=False, **kw)
    return out if Cw == C else out[:, :, :C]


def convresnet_reference(x, weights, biases, matmul_dtype=None):
    """Pure-JAX reference mirroring the PyTorch forward (eval mode).

    If matmul_dtype is given, conv operands are rounded to that dtype (with f32
    accumulation), matching the kernel's bf16-operand MXU matmuls.
    """
    h = jnp.transpose(x, (0, 2, 1))  # (B, C, L)
    for W, bia in zip(weights, biases):
        pad = W.shape[-1] // 2
        lhs, rhs = h, W
        if matmul_dtype is not None:
            lhs = lhs.astype(matmul_dtype).astype(jnp.float32)
            rhs = rhs.astype(matmul_dtype).astype(jnp.float32)
        y = lax.conv_general_dilated(
            lhs, rhs, window_strides=(1,), padding=[(pad, pad)],
            dimension_numbers=("NCH", "OIH", "NCH"))
        y = y + bia[None, :, None]
        y = jnp.maximum(y, NEG_SLOPE * y)
        h = h + y
    return jnp.transpose(h, (0, 2, 1))


def _make_params(key, C, num_layers, kernel_size):
    keys = jax.random.split(key, 2 * num_layers)
    bound = 1.0 / (C * kernel_size) ** 0.5  # PyTorch Conv1d default init bound
    weights, biases = [], []
    for i in range(num_layers):
        W = jax.random.uniform(keys[2 * i], (C, C, kernel_size),
                               minval=-bound, maxval=bound, dtype=jnp.float32)
        b = jax.random.uniform(keys[2 * i + 1], (C,),
                               minval=-bound, maxval=bound, dtype=jnp.float32)
        weights.append(W)
        biases.append(b)
    return weights, biases


def _check(x, weights, biases):
    out = jax.block_until_ready(convresnet_pallas(x, weights, biases))
    assert out.shape == x.shape
    # Tight check vs. a reference with matching bf16-operand rounding / f32 accumulation.
    ref_bf16 = convresnet_reference(x, weights, biases, matmul_dtype=jnp.bfloat16)
    assert jnp.allclose(out, ref_bf16, atol=5e-3, rtol=5e-3), \
        float(jnp.max(jnp.abs(out - ref_bf16)))
    # Loose sanity check vs. the pure-f32 reference (bounds bf16 operand rounding error).
    ref_f32 = convresnet_reference(x, weights, biases)
    assert jnp.allclose(out, ref_f32, atol=5e-2, rtol=5e-2), \
        float(jnp.max(jnp.abs(out - ref_f32)))


if __name__ == "__main__":
    key = jax.random.PRNGKey(0)
    k1, k2, k3, k4 = jax.random.split(key, 4)

    # Primary (small) config: exercises the unpadded small-C per-tap-matmul path.
    B, L, C = 2, 16, 32
    weights, biases = _make_params(k1, C, num_layers=3, kernel_size=3)
    x = jax.random.normal(k2, (B, L, C), dtype=jnp.float32)
    _check(x, weights, biases)

    # Secondary config: lane-multiple channels -> fused-tap matmul path, multi-step
    # batch-blocked grid (checks that shifts don't leak across batch elements).
    B2, L2, C2 = 8, 128, 128
    weights2, biases2 = _make_params(k3, C2, num_layers=3, kernel_size=3)
    x2 = jax.random.normal(k4, (B2, L2, C2), dtype=jnp.float32)
    _check(x2, weights2, biases2)

    print("KERNEL_OK")
</pallas_src>

<mosaic_0001>
module attributes {stable_mosaic.version = 11 : i64} {
  func.func @convresnet_kernel(%arg0: i32, %arg1: memref<2x16x32xf32, #tpu.memory_space<vmem>>, %arg2: memref<3x3x32x32xbf16, #tpu.memory_space<vmem>>, %arg3: memref<3x1x32xf32, #tpu.memory_space<vmem>>, %arg4: memref<2x16x32xf32, #tpu.memory_space<vmem>>) attributes {dimension_semantics = [#tpu.dimension_semantics<parallel>], iteration_bounds = array<i64: 1>, scalar_prefetch = 0 : i64, scratch_operands = 0 : i64, tpu.core_type = #tpu.core_type<tc>, window_params = [{transform_indices = @transform_0, window_bounds = array<i64: 2, 16, 32>}, {pipeline_mode = #tpu.pipeline_mode<synchronous>, transform_indices = @transform_1, window_bounds = array<i64: 3, 3, 32, 32>}, {pipeline_mode = #tpu.pipeline_mode<synchronous>, transform_indices = @transform_2, window_bounds = array<i64: 3, 1, 32>}, {transform_indices = @transform_3, window_bounds = array<i64: 2, 16, 32>}]} {
    %0 = tpu.iota {dimensions = array<i32: 1>} : vector<2x16x32xi32>
    %1 = vector.shape_cast %0 : vector<2x16x32xi32> to vector<32x32xi32>
    %c0 = arith.constant 0 : index
    %c0_0 = arith.constant 0 : index
    %c0_1 = arith.constant 0 : index
    %2 = vector.load %arg1[%c0, %c0_0, %c0_1] : memref<2x16x32xf32, #tpu.memory_space<vmem>>, vector<2x16x32xf32>
    %3 = vector.shape_cast %2 : vector<2x16x32xf32> to vector<32x32xf32>
    %c1_i32 = arith.constant 1 : i32
    %4 = tpu.dynamic_rotate %3 by %c1_i32 dim 0 : vector<32x32xf32>, i32 -> vector<32x32xf32>
    %c1_i32_2 = arith.constant 1 : i32
    %5 = vector.broadcast %c1_i32_2 : i32 to vector<32x32xi32>
    %6 = arith.cmpi sge, %1, %5 : vector<32x32xi32>
    %cst = arith.constant 0.000000e+00 : f32
    %7 = vector.broadcast %cst : f32 to vector<32x32xf32>
    %8 = arith.select %6, %4, %7 : vector<32x32xi1>, vector<32x32xf32>
    %9 = arith.truncf %8 : vector<32x32xf32> to vector<32x32xbf16>
    %10 = arith.truncf %3 : vector<32x32xf32> to vector<32x32xbf16>
    %c31_i32 = arith.constant 31 : i32
    %11 = tpu.dynamic_rotate %3 by %c31_i32 dim 0 : vector<32x32xf32>, i32 -> vector<32x32xf32>
    %c15_i32 = arith.constant 15 : i32
    %12 = vector.broadcast %c15_i32 : i32 to vector<32x32xi32>
    %13 = arith.cmpi slt, %1, %12 : vector<32x32xi32>
    %cst_3 = arith.constant 0.000000e+00 : f32
    %14 = vector.broadcast %cst_3 : f32 to vector<32x32xf32>
    %15 = arith.select %13, %11, %14 : vector<32x32xi1>, vector<32x32xf32>
    %16 = arith.truncf %15 : vector<32x32xf32> to vector<32x32xbf16>
    %c0_4 = arith.constant 0 : index
    %c0_5 = arith.constant 0 : index
    %c0_6 = arith.constant 0 : index
    %c0_7 = arith.constant 0 : index
    %17 = vector.load %arg2[%c0_4, %c0_5, %c0_6, %c0_7] : memref<3x3x32x32xbf16, #tpu.memory_space<vmem>>, vector<1x1x32x32xbf16>
    %18 = vector.shape_cast %17 : vector<1x1x32x32xbf16> to vector<32x32xbf16>
    %cst_8 = arith.constant dense<0.000000e+00> : vector<32x32xf32>
    %19 = tpu.matmul %9, %18, %cst_8 {dimension_numbers = #tpu.dot_dimension_numbers<[1], [0], [0], [1], [0, 0, 1, 1], [], []>} : vector<32x32xbf16>, vector<32x32xbf16>, vector<32x32xf32> -> vector<32x32xf32>
    %c0_9 = arith.constant 0 : index
    %c1 = arith.constant 1 : index
    %c0_10 = arith.constant 0 : index
    %c0_11 = arith.constant 0 : index
    %20 = vector.load %arg2[%c0_9, %c1, %c0_10, %c0_11] : memref<3x3x32x32xbf16, #tpu.memory_space<vmem>>, vector<1x1x32x32xbf16>
    %21 = vector.shape_cast %20 : vector<1x1x32x32xbf16> to vector<32x32xbf16>
    %cst_12 = arith.constant dense<0.000000e+00> : vector<32x32xf32>
    %22 = tpu.matmul %10, %21, %cst_12 {dimension_numbers = #tpu.dot_dimension_numbers<[1], [0], [0], [1], [0, 0, 1, 1], [], []>} : vector<32x32xbf16>, vector<32x32xbf16>, vector<32x32xf32> -> vector<32x32xf32>
    %23 = arith.addf %19, %22 : vector<32x32xf32>
    %c0_13 = arith.constant 0 : index
    %c2 = arith.constant 2 : index
    %c0_14 = arith.constant 0 : index
    %c0_15 = arith.constant 0 : index
    %24 = vector.load %arg2[%c0_13, %c2, %c0_14, %c0_15] : memref<3x3x32x32xbf16, #tpu.memory_space<vmem>>, vector<1x1x32x32xbf16>
    %25 = vector.shape_cast %24 : vector<1x1x32x32xbf16> to vector<32x32xbf16>
    %cst_16 = arith.constant dense<0.000000e+00> : vector<32x32xf32>
    %26 = tpu.matmul %16, %25, %cst_16 {dimension_numbers = #tpu.dot_dimension_numbers<[1], [0], [0], [1], [0, 0, 1, 1], [], []>} : vector<32x32xbf16>, vector<32x32xbf16>, vector<32x32xf32> -> vector<32x32xf32>
    %27 = arith.addf %23, %26 : vector<32x32xf32>
    %c0_17 = arith.constant 0 : index
    %c0_18 = arith.constant 0 : index
    %c0_19 = arith.constant 0 : index
    %28 = vector.load %arg3[%c0_17, %c0_18, %c0_19] : memref<3x1x32xf32, #tpu.memory_space<vmem>>, vector<1x1x32xf32>
    %29 = vector.shape_cast %28 : vector<1x1x32xf32> to vector<1x32xf32>
    %30 = vector.broadcast %29 : vector<1x32xf32> to vector<32x32xf32>
    %31 = arith.addf %27, %30 : vector<32x32xf32>
    %cst_20 = arith.constant 0.00999999977 : f32
    %32 = vector.broadcast %cst_20 : f32 to vector<32x32xf32>
    %33 = arith.mulf %32, %31 : vector<32x32xf32>
    %34 = arith.maximumf %31, %33 : vector<32x32xf32>
    %35 = arith.addf %3, %34 : vector<32x32xf32>
    %c1_i32_21 = arith.constant 1 : i32
    %36 = tpu.dynamic_rotate %35 by %c1_i32_21 dim 0 : vector<32x32xf32>, i32 -> vector<32x32xf32>
    %c1_i32_22 = arith.constant 1 : i32
    %37 = vector.broadcast %c1_i32_22 : i32 to vector<32x32xi32>
    %38 = arith.cmpi sge, %1, %37 : vector<32x32xi32>
    %cst_23 = arith.constant 0.000000e+00 : f32
    %39 = vector.broadcast %cst_23 : f32 to vector<32x32xf32>
    %40 = arith.select %38, %36, %39 : vector<32x32xi1>, vector<32x32xf32>
    %41 = arith.truncf %40 : vector<32x32xf32> to vector<32x32xbf16>
    %42 = arith.truncf %35 : vector<32x32xf32> to vector<32x32xbf16>
    %c31_i32_24 = arith.constant 31 : i32
    %43 = tpu.dynamic_rotate %35 by %c31_i32_24 dim 0 : vector<32x32xf32>, i32 -> vector<32x32xf32>
    %c15_i32_25 = arith.constant 15 : i32
    %44 = vector.broadcast %c15_i32_25 : i32 to vector<32x32xi32>
    %45 = arith.cmpi slt, %1, %44 : vector<32x32xi32>
    %cst_26 = arith.constant 0.000000e+00 : f32
    %46 = vector.broadcast %cst_26 : f32 to vector<32x32xf32>
    %47 = arith.select %45, %43, %46 : vector<32x32xi1>, vector<32x32xf32>
    %48 = arith.truncf %47 : vector<32x32xf32> to vector<32x32xbf16>
    %c1_27 = arith.constant 1 : index
    %c0_28 = arith.constant 0 : index
    %c0_29 = arith.constant 0 : index
    %c0_30 = arith.constant 0 : index
    %49 = vector.load %arg2[%c1_27, %c0_28, %c0_29, %c0_30] : memref<3x3x32x32xbf16, #tpu.memory_space<vmem>>, vector<1x1x32x32xbf16>
    %50 = vector.shape_cast %49 : vector<1x1x32x32xbf16> to vector<32x32xbf16>
    %cst_31 = arith.constant dense<0.000000e+00> : vector<32x32xf32>
    %51 = tpu.matmul %41, %50, %cst_31 {dimension_numbers = #tpu.dot_dimension_numbers<[1], [0], [0], [1], [0, 0, 1, 1], [], []>} : vector<32x32xbf16>, vector<32x32xbf16>, vector<32x32xf32> -> vector<32x32xf32>
    %c1_32 = arith.constant 1 : index
    %c1_33 = arith.constant 1 : index
    %c0_34 = arith.constant 0 : index
    %c0_35 = arith.constant 0 : index
    %52 = vector.load %arg2[%c1_32, %c1_33, %c0_34, %c0_35] : memref<3x3x32x32xbf16, #tpu.memory_space<vmem>>, vector<1x1x32x32xbf16>
    %53 = vector.shape_cast %52 : vector<1x1x32x32xbf16> to vector<32x32xbf16>
    %cst_36 = arith.constant dense<0.000000e+00> : vector<32x32xf32>
    %54 = tpu.matmul %42, %53, %cst_36 {dimension_numbers = #tpu.dot_dimension_numbers<[1], [0], [0], [1], [0, 0, 1, 1], [], []>} : vector<32x32xbf16>, vector<32x32xbf16>, vector<32x32xf32> -> vector<32x32xf32>
    %55 = arith.addf %51, %54 : vector<32x32xf32>
    %c1_37 = arith.constant 1 : index
    %c2_38 = arith.constant 2 : index
    %c0_39 = arith.constant 0 : index
    %c0_40 = arith.constant 0 : index
    %56 = vector.load %arg2[%c1_37, %c2_38, %c0_39, %c0_40] : memref<3x3x32x32xbf16, #tpu.memory_space<vmem>>, vector<1x1x32x32xbf16>
    %57 = vector.shape_cast %56 : vector<1x1x32x32xbf16> to vector<32x32xbf16>
    %cst_41 = arith.constant dense<0.000000e+00> : vector<32x32xf32>
    %58 = tpu.matmul %48, %57, %cst_41 {dimension_numbers = #tpu.dot_dimension_numbers<[1], [0], [0], [1], [0, 0, 1, 1], [], []>} : vector<32x32xbf16>, vector<32x32xbf16>, vector<32x32xf32> -> vector<32x32xf32>
    %59 = arith.addf %55, %58 : vector<32x32xf32>
    %c1_42 = arith.constant 1 : index
    %c0_43 = arith.constant 0 : index
    %c0_44 = arith.constant 0 : index
    %60 = vector.load %arg3[%c1_42, %c0_43, %c0_44] : memref<3x1x32xf32, #tpu.memory_space<vmem>>, vector<1x1x32xf32>
    %61 = vector.shape_cast %60 : vector<1x1x32xf32> to vector<1x32xf32>
    %62 = vector.broadcast %61 : vector<1x32xf32> to vector<32x32xf32>
    %63 = arith.addf %59, %62 : vector<32x32xf32>
    %cst_45 = arith.constant 0.00999999977 : f32
    %64 = vector.broadcast %cst_45 : f32 to vector<32x32xf32>
    %65 = arith.mulf %64, %63 : vector<32x32xf32>
    %66 = arith.maximumf %63, %65 : vector<32x32xf32>
    %67 = arith.addf %35, %66 : vector<32x32xf32>
    %c1_i32_46 = arith.constant 1 : i32
    %68 = tpu.dynamic_rotate %67 by %c1_i32_46 dim 0 : vector<32x32xf32>, i32 -> vector<32x32xf32>
    %c1_i32_47 = arith.constant 1 : i32
    %69 = vector.broadcast %c1_i32_47 : i32 to vector<32x32xi32>
    %70 = arith.cmpi sge, %1, %69 : vector<32x32xi32>
    %cst_48 = arith.constant 0.000000e+00 : f32
    %71 = vector.broadcast %cst_48 : f32 to vector<32x32xf32>
    %72 = arith.select %70, %68, %71 : vector<32x32xi1>, vector<32x32xf32>
    %73 = arith.truncf %72 : vector<32x32xf32> to vector<32x32xbf16>
    %74 = arith.truncf %67 : vector<32x32xf32> to vector<32x32xbf16>
    %c31_i32_49 = arith.constant 31 : i32
    %75 = tpu.dynamic_rotate %67 by %c31_i32_49 dim 0 : vector<32x32xf32>, i32 -> vector<32x32xf32>
    %c15_i32_50 = arith.constant 15 : i32
    %76 = vector.broadcast %c15_i32_50 : i32 to vector<32x32xi32>
    %77 = arith.cmpi slt, %1, %76 : vector<32x32xi32>
    %cst_51 = arith.constant 0.000000e+00 : f32
    %78 = vector.broadcast %cst_51 : f32 to vector<32x32xf32>
    %79 = arith.select %77, %75, %78 : vector<32x32xi1>, vector<32x32xf32>
    %80 = arith.truncf %79 : vector<32x32xf32> to vector<32x32xbf16>
    %c2_52 = arith.constant 2 : index
    %c0_53 = arith.constant 0 : index
    %c0_54 = arith.constant 0 : index
    %c0_55 = arith.constant 0 : index
    %81 = vector.load %arg2[%c2_52, %c0_53, %c0_54, %c0_55] : memref<3x3x32x32xbf16, #tpu.memory_space<vmem>>, vector<1x1x32x32xbf16>
    %82 = vector.shape_cast %81 : vector<1x1x32x32xbf16> to vector<32x32xbf16>
    %cst_56 = arith.constant dense<0.000000e+00> : vector<32x32xf32>
    %83 = tpu.matmul %73, %82, %cst_56 {dimension_numbers = #tpu.dot_dimension_numbers<[1], [0], [0], [1], [0, 0, 1, 1], [], []>} : vector<32x32xbf16>, vector<32x32xbf16>, vector<32x32xf32> -> vector<32x32xf32>
    %c2_57 = arith.constant 2 : index
    %c1_58 = arith.constant 1 : index
    %c0_59 = arith.constant 0 : index
    %c0_60 = arith.constant 0 : index
    %84 = vector.load %arg2[%c2_57, %c1_58, %c0_59, %c0_60] : memref<3x3x32x32xbf16, #tpu.memory_space<vmem>>, vector<1x1x32x32xbf16>
    %85 = vector.shape_cast %84 : vector<1x1x32x32xbf16> to vector<32x32xbf16>
    %cst_61 = arith.constant dense<0.000000e+00> : vector<32x32xf32>
    %86 = tpu.matmul %74, %85, %cst_61 {dimension_numbers = #tpu.dot_dimension_numbers<[1], [0], [0], [1], [0, 0, 1, 1], [], []>} : vector<32x32xbf16>, vector<32x32xbf16>, vector<32x32xf32> -> vector<32x32xf32>
    %87 = arith.addf %83, %86 : vector<32x32xf32>
    %c2_62 = arith.constant 2 : index
    %c2_63 = arith.constant 2 : index
    %c0_64 = arith.constant 0 : index
    %c0_65 = arith.constant 0 : index
    %88 = vector.load %arg2[%c2_62, %c2_63, %c0_64, %c0_65] : memref<3x3x32x32xbf16, #tpu.memory_space<vmem>>, vector<1x1x32x32xbf16>
    %89 = vector.shape_cast %88 : vector<1x1x32x32xbf16> to vector<32x32xbf16>
    %cst_66 = arith.constant dense<0.000000e+00> : vector<32x32xf32>
    %90 = tpu.matmul %80, %89, %cst_66 {dimension_numbers = #tpu.dot_dimension_numbers<[1], [0], [0], [1], [0, 0, 1, 1], [], []>} : vector<32x32xbf16>, vector<32x32xbf16>, vector<32x32xf32> -> vector<32x32xf32>
    %91 = arith.addf %87, %90 : vector<32x32xf32>
    %c2_67 = arith.constant 2 : index
    %c0_68 = arith.constant 0 : index
    %c0_69 = arith.constant 0 : index
    %92 = vector.load %arg3[%c2_67, %c0_68, %c0_69] : memref<3x1x32xf32, #tpu.memory_space<vmem>>, vector<1x1x32xf32>
    %93 = vector.shape_cast %92 : vector<1x1x32xf32> to vector<1x32xf32>
    %94 = vector.broadcast %93 : vector<1x32xf32> to vector<32x32xf32>
    %95 = arith.addf %91, %94 : vector<32x32xf32>
    %cst_70 = arith.constant 0.00999999977 : f32
    %96 = vector.broadcast %cst_70 : f32 to vector<32x32xf32>
    %97 = arith.mulf %96, %95 : vector<32x32xf32>
    %98 = arith.maximumf %95, %97 : vector<32x32xf32>
    %99 = arith.addf %67, %98 : vector<32x32xf32>
    %100 = vector.shape_cast %99 : vector<32x32xf32> to vector<2x16x32xf32>
    %c0_71 = arith.constant 0 : index
    %c0_72 = arith.constant 0 : index
    %c0_73 = arith.constant 0 : index
    %101 = vector.load %arg4[%c0_71, %c0_72, %c0_73] : memref<2x16x32xf32, #tpu.memory_space<vmem>>, vector<2x16x32xf32>
    tpu.vector_store %arg4[%c0_71, %c0_72, %c0_73], %100 {strides = array<i32>} : memref<2x16x32xf32, #tpu.memory_space<vmem>>, vector<2x16x32xf32>,
    return
  }
  func.func @transform_0(%arg0: i32) -> (i32, i32, i32) {
    %c0_i32 = arith.constant 0 : i32
    %c0_i32_0 = arith.constant 0 : i32
    %c0_i32_1 = arith.constant 0 : i32
    return %arg0, %c0_i32, %c0_i32_0 : i32, i32, i32
  }
  func.func @transform_1(%arg0: i32) -> (i32, i32, i32, i32) {
    %c0_i32 = arith.constant 0 : i32
    %c0_i32_0 = arith.constant 0 : i32
    %c0_i32_1 = arith.constant 0 : i32
    %c0_i32_2 = arith.constant 0 : i32
    %c0_i32_3 = arith.constant 0 : i32
    return %c0_i32, %c0_i32_0, %c0_i32_1, %c0_i32_2 : i32, i32, i32, i32
  }
  func.func @transform_2(%arg0: i32) -> (i32, i32, i32) {
    %c0_i32 = arith.constant 0 : i32
    %c0_i32_0 = arith.constant 0 : i32
    %c0_i32_1 = arith.constant 0 : i32
    %c0_i32_2 = arith.constant 0 : i32
    return %c0_i32, %c0_i32_0, %c0_i32_1 : i32, i32, i32
  }
  func.func @transform_3(%arg0: i32) -> (i32, i32, i32) {
    %c0_i32 = arith.constant 0 : i32
    %c0_i32_0 = arith.constant 0 : i32
    %c0_i32_1 = arith.constant 0 : i32
    return %arg0, %c0_i32, %c0_i32_0 : i32, i32, i32
  }
}

module attributes {stable_mosaic.version = 11 : i64} {
  func.func @convresnet_kernel(%arg0: i32, %arg1: memref<2x16x32xf32, #tpu.memory_space<vmem>>, %arg2: memref<3x3x32x32xbf16, #tpu.memory_space<vmem>>, %arg3: memref<3x1x32xf32, #tpu.memory_space<vmem>>, %arg4: memref<2x16x32xf32, #tpu.memory_space<vmem>>) attributes {dimension_semantics = [#tpu.dimension_semantics<parallel>], iteration_bounds = array<i64: 1>, scalar_prefetch = 0 : i64, scratch_operands = 0 : i64, tpu.core_type = #tpu.core_type<tc>, window_params = [{transform_indices = @transform_0, window_bounds = array<i64: 2, 16, 32>}, {pipeline_mode = #tpu.pipeline_mode<synchronous>, transform_indices = @transform_1, window_bounds = array<i64: 3, 3, 32, 32>}, {pipeline_mode = #tpu.pipeline_mode<synchronous>, transform_indices = @transform_2, window_bounds = array<i64: 3, 1, 32>}, {transform_indices = @transform_3, window_bounds = array<i64: 2, 16, 32>}]} {
    %0 = tpu.iota {dimensions = array<i32: 1>} : vector<2x16x32xi32>
    %1 = vector.shape_cast %0 : vector<2x16x32xi32> to vector<32x32xi32>
    %c0 = arith.constant 0 : index
    %c0_0 = arith.constant 0 : index
    %c0_1 = arith.constant 0 : index
    %2 = vector.load %arg1[%c0, %c0_0, %c0_1] : memref<2x16x32xf32, #tpu.memory_space<vmem>>, vector<2x16x32xf32>
    %3 = vector.shape_cast %2 : vector<2x16x32xf32> to vector<32x32xf32>
    %c1_i32 = arith.constant 1 : i32
    %4 = tpu.dynamic_rotate %3 by %c1_i32 dim 0 : vector<32x32xf32>, i32 -> vector<32x32xf32>
    %c1_i32_2 = arith.constant 1 : i32
    %5 = vector.broadcast %c1_i32_2 : i32 to vector<32x32xi32>
    %6 = arith.cmpi sge, %1, %5 : vector<32x32xi32>
    %cst = arith.constant 0.000000e+00 : f32
    %7 = vector.broadcast %cst : f32 to vector<32x32xf32>
    %8 = arith.select %6, %4, %7 : vector<32x32xi1>, vector<32x32xf32>
    %9 = arith.truncf %8 : vector<32x32xf32> to vector<32x32xbf16>
    %10 = arith.truncf %3 : vector<32x32xf32> to vector<32x32xbf16>
    %c31_i32 = arith.constant 31 : i32
    %11 = tpu.dynamic_rotate %3 by %c31_i32 dim 0 : vector<32x32xf32>, i32 -> vector<32x32xf32>
    %c15_i32 = arith.constant 15 : i32
    %12 = vector.broadcast %c15_i32 : i32 to vector<32x32xi32>
    %13 = arith.cmpi slt, %1, %12 : vector<32x32xi32>
    %cst_3 = arith.constant 0.000000e+00 : f32
    %14 = vector.broadcast %cst_3 : f32 to vector<32x32xf32>
    %15 = arith.select %13, %11, %14 : vector<32x32xi1>, vector<32x32xf32>
    %16 = arith.truncf %15 : vector<32x32xf32> to vector<32x32xbf16>
    %c0_4 = arith.constant 0 : index
    %c0_5 = arith.constant 0 : index
    %c0_6 = arith.constant 0 : index
    %c0_7 = arith.constant 0 : index
    %17 = vector.load %arg2[%c0_4, %c0_5, %c0_6, %c0_7] : memref<3x3x32x32xbf16, #tpu.memory_space<vmem>>, vector<1x1x32x32xbf16>
    %18 = vector.shape_cast %17 : vector<1x1x32x32xbf16> to vector<32x32xbf16>
    %cst_8 = arith.constant dense<0.000000e+00> : vector<32x32xf32>
    %19 = tpu.matmul %9, %18, %cst_8 {dimension_numbers = #tpu.dot_dimension_numbers<[1], [0], [0], [1], [0, 0, 1, 1], [], []>} : vector<32x32xbf16>, vector<32x32xbf16>, vector<32x32xf32> -> vector<32x32xf32>
    %c0_9 = arith.constant 0 : index
    %c1 = arith.constant 1 : index
    %c0_10 = arith.constant 0 : index
    %c0_11 = arith.constant 0 : index
    %20 = vector.load %arg2[%c0_9, %c1, %c0_10, %c0_11] : memref<3x3x32x32xbf16, #tpu.memory_space<vmem>>, vector<1x1x32x32xbf16>
    %21 = vector.shape_cast %20 : vector<1x1x32x32xbf16> to vector<32x32xbf16>
    %cst_12 = arith.constant dense<0.000000e+00> : vector<32x32xf32>
    %22 = tpu.matmul %10, %21, %cst_12 {dimension_numbers = #tpu.dot_dimension_numbers<[1], [0], [0], [1], [0, 0, 1, 1], [], []>} : vector<32x32xbf16>, vector<32x32xbf16>, vector<32x32xf32> -> vector<32x32xf32>
    %23 = arith.addf %19, %22 : vector<32x32xf32>
    %c0_13 = arith.constant 0 : index
    %c2 = arith.constant 2 : index
    %c0_14 = arith.constant 0 : index
    %c0_15 = arith.constant 0 : index
    %24 = vector.load %arg2[%c0_13, %c2, %c0_14, %c0_15] : memref<3x3x32x32xbf16, #tpu.memory_space<vmem>>, vector<1x1x32x32xbf16>
    %25 = vector.shape_cast %24 : vector<1x1x32x32xbf16> to vector<32x32xbf16>
    %cst_16 = arith.constant dense<0.000000e+00> : vector<32x32xf32>
    %26 = tpu.matmul %16, %25, %cst_16 {dimension_numbers = #tpu.dot_dimension_numbers<[1], [0], [0], [1], [0, 0, 1, 1], [], []>} : vector<32x32xbf16>, vector<32x32xbf16>, vector<32x32xf32> -> vector<32x32xf32>
    %27 = arith.addf %23, %26 : vector<32x32xf32>
    %c0_17 = arith.constant 0 : index
    %c0_18 = arith.constant 0 : index
    %c0_19 = arith.constant 0 : index
    %28 = vector.load %arg3[%c0_17, %c0_18, %c0_19] : memref<3x1x32xf32, #tpu.memory_space<vmem>>, vector<1x1x32xf32>
    %29 = vector.shape_cast %28 : vector<1x1x32xf32> to vector<1x32xf32>
    %30 = vector.broadcast %29 : vector<1x32xf32> to vector<32x32xf32>
    %31 = arith.addf %27, %30 : vector<32x32xf32>
    %cst_20 = arith.constant 0.00999999977 : f32
    %32 = vector.broadcast %cst_20 : f32 to vector<32x32xf32>
    %33 = arith.mulf %32, %31 : vector<32x32xf32>
    %34 = arith.maximumf %31, %33 : vector<32x32xf32>
    %35 = arith.addf %3, %34 : vector<32x32xf32>
    %c1_i32_21 = arith.constant 1 : i32
    %36 = tpu.dynamic_rotate %35 by %c1_i32_21 dim 0 : vector<32x32xf32>, i32 -> vector<32x32xf32>
    %c1_i32_22 = arith.constant 1 : i32
    %37 = vector.broadcast %c1_i32_22 : i32 to vector<32x32xi32>
    %38 = arith.cmpi sge, %1, %37 : vector<32x32xi32>
    %cst_23 = arith.constant 0.000000e+00 : f32
    %39 = vector.broadcast %cst_23 : f32 to vector<32x32xf32>
    %40 = arith.select %38, %36, %39 : vector<32x32xi1>, vector<32x32xf32>
    %41 = arith.truncf %40 : vector<32x32xf32> to vector<32x32xbf16>
    %42 = arith.truncf %35 : vector<32x32xf32> to vector<32x32xbf16>
    %c31_i32_24 = arith.constant 31 : i32
    %43 = tpu.dynamic_rotate %35 by %c31_i32_24 dim 0 : vector<32x32xf32>, i32 -> vector<32x32xf32>
    %c15_i32_25 = arith.constant 15 : i32
    %44 = vector.broadcast %c15_i32_25 : i32 to vector<32x32xi32>
    %45 = arith.cmpi slt, %1, %44 : vector<32x32xi32>
    %cst_26 = arith.constant 0.000000e+00 : f32
    %46 = vector.broadcast %cst_26 : f32 to vector<32x32xf32>
    %47 = arith.select %45, %43, %46 : vector<32x32xi1>, vector<32x32xf32>
    %48 = arith.truncf %47 : vector<32x32xf32> to vector<32x32xbf16>
    %c1_27 = arith.constant 1 : index
    %c0_28 = arith.constant 0 : index
    %c0_29 = arith.constant 0 : index
    %c0_30 = arith.constant 0 : index
    %49 = vector.load %arg2[%c1_27, %c0_28, %c0_29, %c0_30] : memref<3x3x32x32xbf16, #tpu.memory_space<vmem>>, vector<1x1x32x32xbf16>
    %50 = vector.shape_cast %49 : vector<1x1x32x32xbf16> to vector<32x32xbf16>
    %cst_31 = arith.constant dense<0.000000e+00> : vector<32x32xf32>
    %51 = tpu.matmul %41, %50, %cst_31 {dimension_numbers = #tpu.dot_dimension_numbers<[1], [0], [0], [1], [0, 0, 1, 1], [], []>} : vector<32x32xbf16>, vector<32x32xbf16>, vector<32x32xf32> -> vector<32x32xf32>
    %c1_32 = arith.constant 1 : index
    %c1_33 = arith.constant 1 : index
    %c0_34 = arith.constant 0 : index
    %c0_35 = arith.constant 0 : index
    %52 = vector.load %arg2[%c1_32, %c1_33, %c0_34, %c0_35] : memref<3x3x32x32xbf16, #tpu.memory_space<vmem>>, vector<1x1x32x32xbf16>
    %53 = vector.shape_cast %52 : vector<1x1x32x32xbf16> to vector<32x32xbf16>
    %cst_36 = arith.constant dense<0.000000e+00> : vector<32x32xf32>
    %54 = tpu.matmul %42, %53, %cst_36 {dimension_numbers = #tpu.dot_dimension_numbers<[1], [0], [0], [1], [0, 0, 1, 1], [], []>} : vector<32x32xbf16>, vector<32x32xbf16>, vector<32x32xf32> -> vector<32x32xf32>
    %55 = arith.addf %51, %54 : vector<32x32xf32>
    %c1_37 = arith.constant 1 : index
    %c2_38 = arith.constant 2 : index
    %c0_39 = arith.constant 0 : index
    %c0_40 = arith.constant 0 : index
    %56 = vector.load %arg2[%c1_37, %c2_38, %c0_39, %c0_40] : memref<3x3x32x32xbf16, #tpu.memory_space<vmem>>, vector<1x1x32x32xbf16>
    %57 = vector.shape_cast %56 : vector<1x1x32x32xbf16> to vector<32x32xbf16>
    %cst_41 = arith.constant dense<0.000000e+00> : vector<32x32xf32>
    %58 = tpu.matmul %48, %57, %cst_41 {dimension_numbers = #tpu.dot_dimension_numbers<[1], [0], [0], [1], [0, 0, 1, 1], [], []>} : vector<32x32xbf16>, vector<32x32xbf16>, vector<32x32xf32> -> vector<32x32xf32>
    %59 = arith.addf %55, %58 : vector<32x32xf32>
    %c1_42 = arith.constant 1 : index
    %c0_43 = arith.constant 0 : index
    %c0_44 = arith.constant 0 : index
    %60 = vector.load %arg3[%c1_42, %c0_43, %c0_44] : memref<3x1x32xf32, #tpu.memory_space<vmem>>, vector<1x1x32xf32>
    %61 = vector.shape_cast %60 : vector<1x1x32xf32> to vector<1x32xf32>
    %62 = vector.broadcast %61 : vector<1x32xf32> to vector<32x32xf32>
    %63 = arith.addf %59, %62 : vector<32x32xf32>
    %cst_45 = arith.constant 0.00999999977 : f32
    %64 = vector.broadcast %cst_45 : f32 to vector<32x32xf32>
    %65 = arith.mulf %64, %63 : vector<32x32xf32>
    %66 = arith.maximumf %63, %65 : vector<32x32xf32>
    %67 = arith.addf %35, %66 : vector<32x32xf32>
    %c1_i32_46 = arith.constant 1 : i32
    %68 = tpu.dynamic_rotate %67 by %c1_i32_46 dim 0 : vector<32x32xf32>, i32 -> vector<32x32xf32>
    %c1_i32_47 = arith.constant 1 : i32
    %69 = vector.broadcast %c1_i32_47 : i32 to vector<32x32xi32>
    %70 = arith.cmpi sge, %1, %69 : vector<32x32xi32>
    %cst_48 = arith.constant 0.000000e+00 : f32
    %71 = vector.broadcast %cst_48 : f32 to vector<32x32xf32>
    %72 = arith.select %70, %68, %71 : vector<32x32xi1>, vector<32x32xf32>
    %73 = arith.truncf %72 : vector<32x32xf32> to vector<32x32xbf16>
    %74 = arith.truncf %67 : vector<32x32xf32> to vector<32x32xbf16>
    %c31_i32_49 = arith.constant 31 : i32
    %75 = tpu.dynamic_rotate %67 by %c31_i32_49 dim 0 : vector<32x32xf32>, i32 -> vector<32x32xf32>
    %c15_i32_50 = arith.constant 15 : i32
    %76 = vector.broadcast %c15_i32_50 : i32 to vector<32x32xi32>
    %77 = arith.cmpi slt, %1, %76 : vector<32x32xi32>
    %cst_51 = arith.constant 0.000000e+00 : f32
    %78 = vector.broadcast %cst_51 : f32 to vector<32x32xf32>
    %79 = arith.select %77, %75, %78 : vector<32x32xi1>, vector<32x32xf32>
    %80 = arith.truncf %79 : vector<32x32xf32> to vector<32x32xbf16>
    %c2_52 = arith.constant 2 : index
    %c0_53 = arith.constant 0 : index
    %c0_54 = arith.constant 0 : index
    %c0_55 = arith.constant 0 : index
    %81 = vector.load %arg2[%c2_52, %c0_53, %c0_54, %c0_55] : memref<3x3x32x32xbf16, #tpu.memory_space<vmem>>, vector<1x1x32x32xbf16>
    %82 = vector.shape_cast %81 : vector<1x1x32x32xbf16> to vector<32x32xbf16>
    %cst_56 = arith.constant dense<0.000000e+00> : vector<32x32xf32>
    %83 = tpu.matmul %73, %82, %cst_56 {dimension_numbers = #tpu.dot_dimension_numbers<[1], [0], [0], [1], [0, 0, 1, 1], [], []>} : vector<32x32xbf16>, vector<32x32xbf16>, vector<32x32xf32> -> vector<32x32xf32>
    %c2_57 = arith.constant 2 : index
    %c1_58 = arith.constant 1 : index
    %c0_59 = arith.constant 0 : index
    %c0_60 = arith.constant 0 : index
    %84 = vector.load %arg2[%c2_57, %c1_58, %c0_59, %c0_60] : memref<3x3x32x32xbf16, #tpu.memory_space<vmem>>, vector<1x1x32x32xbf16>
    %85 = vector.shape_cast %84 : vector<1x1x32x32xbf16> to vector<32x32xbf16>
    %cst_61 = arith.constant dense<0.000000e+00> : vector<32x32xf32>
    %86 = tpu.matmul %74, %85, %cst_61 {dimension_numbers = #tpu.dot_dimension_numbers<[1], [0], [0], [1], [0, 0, 1, 1], [], []>} : vector<32x32xbf16>, vector<32x32xbf16>, vector<32x32xf32> -> vector<32x32xf32>
    %87 = arith.addf %83, %86 : vector<32x32xf32>
    %c2_62 = arith.constant 2 : index
    %c2_63 = arith.constant 2 : index
    %c0_64 = arith.constant 0 : index
    %c0_65 = arith.constant 0 : index
    %88 = vector.load %arg2[%c2_62, %c2_63, %c0_64, %c0_65] : memref<3x3x32x32xbf16, #tpu.memory_space<vmem>>, vector<1x1x32x32xbf16>
    %89 = vector.shape_cast %88 : vector<1x1x32x32xbf16> to vector<32x32xbf16>
    %cst_66 = arith.constant dense<0.000000e+00> : vector<32x32xf32>
    %90 = tpu.matmul %80, %89, %cst_66 {dimension_numbers = #tpu.dot_dimension_numbers<[1], [0], [0], [1], [0, 0, 1, 1], [], []>} : vector<32x32xbf16>, vector<32x32xbf16>, vector<32x32xf32> -> vector<32x32xf32>
    %91 = arith.addf %87, %90 : vector<32x32xf32>
    %c2_67 = arith.constant 2 : index
    %c0_68 = arith.constant 0 : index
    %c0_69 = arith.constant 0 : index
    %92 = vector.load %arg3[%c2_67, %c0_68, %c0_69] : memref<3x1x32xf32, #tpu.memory_space<vmem>>, vector<1x1x32xf32>
    %93 = vector.shape_cast %92 : vector<1x1x32xf32> to vector<1x32xf32>
    %94 = vector.broadcast %93 : vector<1x32xf32> to vector<32x32xf32>
    %95 = arith.addf %91, %94 : vector<32x32xf32>
    %cst_70 = arith.constant 0.00999999977 : f32
    %96 = vector.broadcast %cst_70 : f32 to vector<32x32xf32>
    %97 = arith.mulf %96, %95 : vector<32x32xf32>
    %98 = arith.maximumf %95, %97 : vector<32x32xf32>
    %99 = arith.addf %67, %98 : vector<32x32xf32>
    %100 = vector.shape_cast %99 : vector<32x32xf32> to vector<2x16x32xf32>
    %c0_71 = arith.constant 0 : index
    %c0_72 = arith.constant 0 : index
    %c0_73 = arith.constant 0 : index
    %101 = vector.load %arg4[%c0_71, %c0_72, %c0_73] : memref<2x16x32xf32, #tpu.memory_space<vmem>>, vector<2x16x32xf32>
    tpu.vector_store %arg4[%c0_71, %c0_72, %c0_73], %100 {strides = array<i32>} : memref<2x16x32xf32, #tpu.memory_space<vmem>>, vector<2x16x32xf32>,
    return
  }
  func.func @transform_0(%arg0: i32) -> (i32, i32, i32) {
    %c0_i32 = arith.constant 0 : i32
    %c0_i32_0 = arith.constant 0 : i32
    %c0_i32_1 = arith.constant 0 : i32
    return %arg0, %c0_i32, %c0_i32_0 : i32, i32, i32
  }
  func.func @transform_1(%arg0: i32) -> (i32, i32, i32, i32) {
    %c0_i32 = arith.constant 0 : i32
    %c0_i32_0 = arith.constant 0 : i32
    %c0_i32_1 = arith.constant 0 : i32
    %c0_i32_2 = arith.constant 0 : i32
    %c0_i32_3 = arith.constant 0 : i32
    return %c0_i32, %c0_i32_0, %c0_i32_1, %c0_i32_2 : i32, i32, i32, i32
  }
  func.func @transform_2(%arg0: i32) -> (i32, i32, i32) {
    %c0_i32 = arith.constant 0 : i32
    %c0_i32_0 = arith.constant 0 : i32
    %c0_i32_1 = arith.constant 0 : i32
    %c0_i32_2 = arith.constant 0 : i32
    return %c0_i32, %c0_i32_0, %c0_i32_1 : i32, i32, i32
  }
  func.func @transform_3(%arg0: i32) -> (i32, i32, i32) {
    %c0_i32 = arith.constant 0 : i32
    %c0_i32_0 = arith.constant 0 : i32
    %c0_i32_1 = arith.constant 0 : i32
    return %arg0, %c0_i32, %c0_i32_0 : i32, i32, i32
  }
}

</mosaic_0001>

<bundles_post_ra>
// kernel: _convresnet_call.1
= control target key start
LH: loop header
LB: loop body
LE: loop exit
PB: predicated region body
PF: predicated region fallthrough
CT: control target
= control target key end

     0   :  { %8 = vsyncpa [#allocation3], 0  ;;  %s1417_s0 = inlined_call_operand.hbm [shape: f32[2,16,32], index: 0, kind: input, shape index: {}]   ;;  %s1418_s1 = inlined_call_operand.hbm [shape: bf16[3,3,32,32], index: 1, kind: input, shape index: {}]   ;;  %s1419_s2 = inlined_call_operand.vmem [shape: f32[3,1,32], index: 2, kind: input, shape index: {}]   ;;  %s1420_s3 = inlined_call_operand.hbm [shape: f32[2,16,32], index: 3, kind: output, shape index: {}]  }
   0x1   :  { %9 = vsyncpa [#allocation6], 0 }
   0x2   :  { %10 = vsyncpa [#allocation4], 0  ;;  %s1170_s12 = smov [#allocation2]   ;;  %s1098_s16 = scalar_lea.hbm %s1417_s0, 512 }
   0x3   :  { %s16_s13 = sshll.u32 %s1170_s12, 4  ;;  %p1099_p0 = scmp.ne.s32.totalorder %s1417_s0, %s1098_s16  ;;  %s17_s13 = int_to_ptr.vmem [resolvable:$true] %s16_s13 }
   0x4   :  { %p1102_p1 = scmp.lt.u32.totalorder %s1098_s16, %s1417_s0 }
   0x6   :  { %p1104_p2 = pnand %p1102_p1, %p1099_p0 }
   0x8   :  { %1107 = shalt.err (!%p1104_p2)
}
   0x9   :  { %s1108_s21 = scalar_lea.vmem %s17_s13, 512  ;;  %p1113_p4 = scmp.lt.s32.totalorder %s17_s13, %s17_s13 }
   0xa   :  { %p1109_p3 = scmp.ne.s32.totalorder %s17_s13, %s1108_s21  ;;  %p1114_p5 = scmp.lt.s32.totalorder %s1108_s21, %s1108_s21 }
   0xc   :  { %p1115_p6 = por %p1114_p5, %p1113_p4 }
   0xe   :  { %p1116_p7 = pnand %p1115_p6, %p1109_p3 }
  0x10   :  { %1119 = shalt.err (!%p1116_p7)
}
  0x11   :  { %s1171_s22 = smov 128   ;;  %s1172_s23 = smov 8  }
  0x12   :  { %22 = dma.hbm_to_vmem [thread:$0]  %s1417_s0, 512, %s17_s13, [#allocation3], %s1171_s22, %s1171_s22, %s1172_s23  }
  0x13   :  { %s1173_s26 = smov [#allocation5]   ;;  %s1120_s30 = scalar_lea.hbm %s1418_s1, 2304 }
  0x14   :  { %s28_s27 = sshll.u32 %s1173_s26, 4  ;;  %p1121_p8 = scmp.ne.s32.totalorder %s1418_s1, %s1120_s30  ;;  %s29_s27 = int_to_ptr.vmem [resolvable:$true] %s28_s27 }
  0x15   :  { %p1124_p9 = scmp.lt.u32.totalorder %s1120_s30, %s1418_s1 }
  0x17   :  { %p1126_p10 = pnand %p1124_p9, %p1121_p8 }
  0x19   :  { %1129 = shalt.err (!%p1126_p10)
}
  0x1a   :  { %s1130_s8 = scalar_lea.vmem %s29_s27, 2304  ;;  %p1135_p12 = scmp.lt.s32.totalorder %s29_s27, %s29_s27 }
  0x1b   :  { %p1131_p11 = scmp.ne.s32.totalorder %s29_s27, %s1130_s8  ;;  %p1136_p13 = scmp.lt.s32.totalorder %s1130_s8, %s1130_s8 }
  0x1d   :  { %p1137_p0 = por %p1136_p13, %p1135_p12 }
  0x1f   :  { %p1138_p1 = pnand %p1137_p0, %p1131_p11 }
  0x21   :  { %1141 = shalt.err (!%p1138_p1)
}
  0x22   :  { %s1174_s0 = smov 64   ;;  %s1175_s9 = smov 4  }
  0x23   :  { %34 = dma.hbm_to_vmem [thread:$0]  %s1418_s1, 2304, %s29_s27, [#allocation6], %s1174_s0, %s1174_s0, %s1175_s9  }
  0x24   :  { %1164 = dma.done.wait [#allocation3], 512  }
  0x25   :  { %1165 = vsyncadd [#allocation3], 4294966784 }
  0x26   :  { %1166 = dma.done.wait [#allocation6], 2304  }
  0x27   :  { %1167 = vsyncadd [#allocation6], 4294964992  ;;  %v44_v0 = vlaneseq  ;;  %v1080_v3 = vld [vmem:[#allocation5] sm:$0xff]   ;;  %vm108_vm0 = vcmask 261120   ;;  %v1081_v4 = vld [vmem:[#allocation5 + $0x8] sm:$0xff]   ;;  %s1176_s17 = smov [#allocation7]  }
  0x28   :  { %985 = vmatprep.subr.bf16.mxu0 %v1080_v3  ;;  %v1230_v5 = vld [vmem:[#allocation2] sm:$0xff]  ;;  %v1232_v6 = vld [vmem:[#allocation2 + $0x8] sm:$0xff]  ;;  %v1234_v7 = vld [vmem:[#allocation2 + $0x18] sm:$0xff]  ;;  %s887_s18 = sshll.u32 %s1176_s17, 4  ;;  %s888_s18 = int_to_ptr.vmem [resolvable:$true] %s887_s18 }
  0x29   :  { %v1224_v1 = vshrl.u32 %v44_v0, 7  ;;  %986 = vmatpush3.bf16.msra.mxu0 %v1080_v3  ;;  %v51_v8 = vrot.slane %v1230_v5, 7  ;;  %v52_v9 = vrot.slane %v1232_v6, 7  ;;  %v54_v10 = vrot.slane %v1234_v7, 7  ;;  %v1243_v12 = vld [vmem:[#allocation2 + $0x10] sm:$0xff]  ;;  %v1082_v13 = vld [vmem:[#allocation5 + $0x20] sm:$0xff]   ;;  %p1147_p3 = scmp.lt.s32.totalorder %s888_s18, %s888_s18 }
  0x2a   :  { %v73_v11 = vrot.slane %v1234_v7, 1  ;;  %987 = vmatprep.subr.bf16.mxu0 %v1081_v4  ;;  %v53_v14 = vrot.slane %v1243_v12, 7  ;;  %v1083_v15 = vld [vmem:[#allocation5 + $0x10] sm:$0xff]   ;;  %v68_v16 = vpack.c.bf16 %v1232_v6, %v1230_v5  ;;  %v1084_v22 = vld [vmem:[#allocation5 + $0x18] sm:$0xff]   ;;  %v70_v25 = vrot.slane %v1230_v5, 1  ;;  %v1085_v28 = vld [vmem:[#allocation5 + $0x28] sm:$0xff]  }
  0x2b   :  { %v1227_v2 = vadd.s32 8, %v1224_v1  ;;  %vm55_vm1 = vcmp.lt.s32.totalorder %v1224_v1, 1  ;;  %vm60_vm2 = vcmp.ge.s32.totalorder %v1224_v1, 1  ;;  %vm74_vm3 = vcmp.lt.s32.totalorder %v1224_v1, 7  ;;  %977 = vmatprep.subr.bf16.mxu1 %v1083_v15  ;;  %v1086_v39 = vld [vmem:[#allocation5 + $0x40] sm:$0xff]   ;;  %v1087_v40 = vld [vmem:[#allocation5 + $0x48] sm:$0xff]  }
  0x2c   :  { %v58_v17 = vsel %vm55_vm1, %v51_v8, %v52_v9  ;;  %v59_v18 = vsel %vm55_vm1, %v54_v10, %v51_v8  ;;  %v56_v20 = vsel %vm55_vm1, %v53_v14, %v54_v10  ;;  %v57_v21 = vsel %vm55_vm1, %v52_v9, %v53_v14  ;;  %981 = vmatprep.mubr.msk.bf16.mxu1 %vm108_vm0, %v68_v16  ;;  %v1088_v41 = vld [vmem:[#allocation5 + $0x30] sm:$0xff]   ;;  %v912_v47 = vld [vmem:[%s1419_s2] ss:$0 sm:$0xff] }
  0x2d   :  { %vm80_vm4 = vcmp.lt.s32.totalorder %v1227_v2, 15  ;;  %v62_v19 = vsel %vm60_vm2, %v59_v18, 0.0  ;;  %988 = vmatpush3.bf16.msra.mxu0 %v1081_v4  ;;  %v64_v24 = vsel %vm60_vm2, %v57_v21, 0.0  ;;  %978 = vmatpush3.bf16.msra.mxu1 %v1083_v15  ;;  %v71_v26 = vrot.slane %v1232_v6, 1  ;;  %v1090_v21 = vld [vmem:[#allocation5 + $0x50] sm:$0xff]  }
  0x2e   :  { %v66_v23 = vpack.c.bf16 %v58_v17, %v62_v19  ;;  %v67_v27 = vpack.c.bf16 %v56_v20, %v64_v24  ;;  %993 = vmatprep.subr.bf16.mxu0 %v1082_v13  ;;  %979 = vmatprep.subr.bf16.mxu1 %v1084_v22  ;;  %v72_v29 = vrot.slane %v1243_v12, 1  ;;  %v78_v31 = vsel %vm74_vm3, %v73_v11, %v70_v25 }
  0x2f   :  { %v77_v30 = vsel %vm74_vm3, %v70_v25, %v71_v26  ;;  %v69_v32 = vpack.c.bf16 %v1234_v7, %v1243_v12  ;;  %v84_v35 = vsel %vm80_vm4, %v78_v31, 0.0  ;;  %v1091_v31 = vld [vmem:[#allocation5 + $0x58] sm:$0xff]  }
  0x30   :  { %989 = vmatprep.mubr.msk.bf16.mxu0 %vm108_vm0, %v66_v23  ;;  %v76_v33 = vsel %vm74_vm3, %v71_v26, %v72_v29  ;;  %v75_v37 = vsel %vm74_vm3, %v72_v29, %v73_v11 }
  0x31   :  { %990 = vmatmul.mubr.msk.bf16.vlgmr.msra.gmra.mrb[0].mxu0 %vm108_vm0, %v67_v27  ;;  %980 = vmatpush3.bf16.msra.mxu1 %v1084_v22  ;;  %v82_v34 = vsel %vm80_vm4, %v76_v33, 0.0  ;;  %v86_v38 = vpack.c.bf16 %v84_v35, %v75_v37 }
  0x32   :  { %994 = vmatpush3.bf16.msra.mxu0 %v1082_v13  ;;  %v85_v36 = vpack.c.bf16 %v82_v34, %v77_v30  ;;  %1001 = vmatprep.subr.bf16.mxu1 %v1086_v39 }
  0x33   :  { %995 = vmatprep.subr.bf16.mxu0 %v1085_v28 }
  0x34   :  { %982 = vmatmul.mubr.msk.bf16.vlgmr.msra.gmra.mrb[0].mxu1 %vm108_vm0, %v69_v32  ;;  %997 = vmatprep.mubr.msk.bf16.mxu0 %vm108_vm0, %v85_v36 }
  0x35   :  { %1002 = vmatpush3.bf16.msra.mxu1 %v1086_v39  ;;  %v1093_v39 = vld [vmem:[#allocation5 + $0x78] sm:$0xff]  }
  0x36   :  { %996 = vmatpush3.bf16.msra.mxu0 %v1085_v28  ;;  %1003 = vmatprep.subr.bf16.mxu1 %v1087_v40 }
  0x39   :  { %1004 = vmatpush3.bf16.msra.mxu1 %v1087_v40  ;;  %v1094_v40 = vld [vmem:[#allocation5 + $0x60] sm:$0xff]  }
  0x3a   :  { %1009 = vmatprep.subr.bf16.mxu1 %v1088_v41 }
  0x3d   :  { %998 = vmatmul.mubr.msk.bf16.vlgmr.msra.gmra.mrb[0].mxu0 %vm108_vm0, %v86_v38  ;;  %v1092_v38 = vld [vmem:[#allocation5 + $0x70] sm:$0xff]  }
  0x3e   :  { %1025 = vmatprep.subr.bf16.mxu0 %v1092_v38 }
  0x3f   :  { %1026 = vmatpush3.bf16.msra.mxu0 %v1092_v38 }
  0x40   :  { %1027 = vmatprep.subr.bf16.mxu0 %v1093_v39 }
  0x43   :  { %1028 = vmatpush3.bf16.msra.mxu0 %v1093_v39 }
  0x44   :  { %1033 = vmatprep.subr.bf16.mxu0 %v1094_v40 }
 0x107   :  { %v983_v42 = vpop.f32.mrb[0].mxu1 }
 0x108   :  { %v149_v43 = vpop.f32.mrb[1].mxu1 }
 0x109   :  { %v984_v44 = vpop.f32.mrb[2].mxu1 }
 0x10a   :  { %v152_v45 = vpop.f32.mrb[3].mxu1 }
 0x110   :  { %v999_v46 = vpop.f32.mrb[0].mxu0 }
 0x111   :  { %v1049_v48 = vadd.f32 %v999_v46, %v983_v42  ;;  %v288_v49 = vpop.f32.mrb[1].mxu0 }
 0x112   :  { %v1050_v50 = vadd.f32 %v288_v49, %v149_v43  ;;  %v1000_v51 = vpop.f32.mrb[2].mxu0 }
 0x113   :  { %v316_v52 = vadd.f32 %v1049_v48, %v912_v47  ;;  %v1051_v53 = vadd.f32 %v1000_v51, %v984_v44  ;;  %v291_v54 = vpop.f32.mrb[3].mxu0 }
 0x114   :  { %v314_v55 = vadd.f32 %v1050_v50, %v912_v47  ;;  %v1052_v56 = vadd.f32 %v291_v54, %v152_v45 }
 0x115   :  { %v320_v57 = vmul.f32 0.01, %v316_v52  ;;  %v317_v58 = vadd.f32 %v1051_v53, %v912_v47 }
 0x116   :  { %v318_v59 = vmul.f32 0.01, %v314_v55  ;;  %v315_v60 = vadd.f32 %v1052_v56, %v912_v47 }
 0x117   :  { %v321_v61 = vmul.f32 0.01, %v317_v58  ;;  %v324_v0 = vmax.f32 %v316_v52, %v320_v57 }
 0x118   :  { %v322_v62 = vmax.f32 %v314_v55, %v318_v59  ;;  %v319_v63 = vmul.f32 0.01, %v315_v60 }
 0x119   :  { %v325_v3 = vmax.f32 %v317_v58, %v321_v61  ;;  %v1297_v13 = vadd.f32 %v324_v0, %v1243_v12 }
 0x11a   :  { %v1287_v4 = vadd.f32 %v322_v62, %v1230_v5  ;;  %v323_v8 = vmax.f32 %v315_v60, %v319_v63 }
 0x11b   :  { %v1290_v9 = vadd.f32 %v325_v3, %v1234_v7  ;;  %v332_v20 = vrot.slane %v1297_v13, 7  ;;  %v348_v22 = vrot.slane %v1297_v13, 1 }
 0x11c   :  { %v1293_v10 = vadd.f32 %v323_v8, %v1232_v6  ;;  %v330_v11 = vrot.slane %v1287_v4, 7  ;;  %v1089_v6 = vld [vmem:[#allocation5 + $0x38] sm:$0xff]   ;;  %v346_v25 = vrot.slane %v1287_v4, 1 }
 0x11d   :  { %v333_v14 = vrot.slane %v1290_v9, 7  ;;  %v345_v16 = vpack.c.bf16 %v1290_v9, %v1297_v13  ;;  %v349_v33 = vrot.slane %v1290_v9, 1 }
 0x11e   :  { %v344_v15 = vpack.c.bf16 %v1293_v10, %v1287_v4  ;;  %v331_v5 = vrot.slane %v1293_v10, 7  ;;  %v347_v19 = vrot.slane %v1293_v10, 1 }
 0x11f   :  { %v337_v7 = vsel %vm55_vm1, %v333_v14, %v330_v11  ;;  %v334_v29 = vsel %vm55_vm1, %v332_v20, %v333_v14  ;;  %v353_v34 = vsel %vm74_vm3, %v349_v33, %v346_v25  ;;  %v350_v35 = vsel %vm74_vm3, %v348_v22, %v349_v33 }
 0x120   :  { %1005 = vmatprep.mubr.msk.bf16.mxu1 %vm108_vm0, %v344_v15  ;;  %v336_v12 = vsel %vm55_vm1, %v330_v11, %v331_v5  ;;  %v338_v17 = vsel %vm60_vm2, %v337_v7, 0.0  ;;  %v335_v23 = vsel %vm55_vm1, %v331_v5, %v332_v20  ;;  %v351_v24 = vsel %vm74_vm3, %v347_v19, %v348_v22  ;;  %v1096_v5 = vld [vmem:[#allocation5 + $0x80] sm:$0xff]   ;;  %v1097_v22 = vld [vmem:[#allocation5 + $0x88] sm:$0xff]  }
 0x121   :  { %1006 = vmatmul.mubr.msk.bf16.vlgmr.msra.gmra.mrb[4].mxu1 %vm108_vm0, %v345_v16  ;;  %v342_v18 = vpack.c.bf16 %v336_v12, %v338_v17  ;;  %v340_v26 = vsel %vm60_vm2, %v335_v23, 0.0  ;;  %v352_v27 = vsel %vm74_vm3, %v346_v25, %v347_v19  ;;  %v355_v28 = vsel %vm80_vm4, %v351_v24, 0.0 }
 0x122   :  { %1010 = vmatpush3.bf16.msra.mxu1 %v1088_v41  ;;  %v343_v30 = vpack.c.bf16 %v334_v29, %v340_v26  ;;  %v358_v32 = vpack.c.bf16 %v355_v28, %v352_v27  ;;  %v357_v36 = vsel %vm80_vm4, %v353_v34, 0.0  ;;  %v926_v41 = vld [vmem:[%s1419_s2 + $0x1] ss:$0 sm:$0xff]  ;;  %v940_v29 = vld [vmem:[%s1419_s2 + $0x2] ss:$0 sm:$0xff]  ;;  %s1142_s2 = scalar_lea.vmem %s888_s18, 512 }
 0x123   :  { %1013 = vmatprep.mubr.msk.bf16.mxu1 %vm108_vm0, %v342_v18  ;;  %1011 = vmatprep.subr.bf16.mxu1 %v1089_v6  ;;  %v359_v37 = vpack.c.bf16 %v357_v36, %v350_v35  ;;  %p1143_p2 = scmp.ne.s32.totalorder %s888_s18, %s1142_s2  ;;  %p1148_p4 = scmp.lt.s32.totalorder %s1142_s2, %s1142_s2 }
 0x125   :  { %p1149_p5 = por %p1148_p4, %p1147_p3 }
 0x126   :  { %1012 = vmatpush3.bf16.msra.mxu1 %v1089_v6 }
 0x127   :  { %1017 = vmatprep.subr.bf16.mxu1 %v1090_v21  ;;  %p1150_p6 = pnand %p1149_p5, %p1143_p2 }
 0x12d   :  { %1014 = vmatmul.mubr.msk.bf16.vlgmr.msra.gmra.mrb[4].mxu1 %vm108_vm0, %v343_v30 }
 0x12e   :  { %1018 = vmatpush3.bf16.msra.mxu1 %v1090_v21  ;;  %1021 = vmatprep.mubr.msk.bf16.mxu1 %vm108_vm0, %v358_v32 }
 0x12f   :  { %1019 = vmatprep.subr.bf16.mxu1 %v1091_v31 }
 0x132   :  { %1020 = vmatpush3.bf16.msra.mxu1 %v1091_v31 }
 0x139   :  { %1022 = vmatmul.mubr.msk.bf16.vlgmr.msra.gmra.mrb[4].mxu1 %vm108_vm0, %v359_v37 }
 0x20c   :  { %v1023_v42 = vpop.f32.mrb[4].mxu1 }
 0x20d   :  { %v590_v43 = vadd.f32 %v1023_v42, %v926_v41  ;;  %v561_v44 = vpop.f32.mrb[5].mxu1 }
 0x20e   :  { %v588_v45 = vadd.f32 %v926_v41, %v561_v44  ;;  %v1024_v46 = vpop.f32.mrb[6].mxu1 }
 0x20f   :  { %v594_v47 = vmul.f32 0.01, %v590_v43  ;;  %v591_v48 = vadd.f32 %v1024_v46, %v926_v41  ;;  %v564_v49 = vpop.f32.mrb[7].mxu1 }
 0x210   :  { %v592_v50 = vmul.f32 0.01, %v588_v45  ;;  %v589_v51 = vadd.f32 %v926_v41, %v564_v49 }
 0x211   :  { %v595_v52 = vmul.f32 0.01, %v591_v48  ;;  %v598_v55 = vmax.f32 %v590_v43, %v594_v47 }
 0x212   :  { %v596_v53 = vmax.f32 %v588_v45, %v592_v50  ;;  %v593_v54 = vmul.f32 0.01, %v589_v51 }
 0x213   :  { %v599_v56 = vmax.f32 %v591_v48, %v595_v52  ;;  %v602_v62 = vadd.f32 %v598_v55, %v1297_v13 }
 0x214   :  { %v1344_v57 = vadd.f32 %v596_v53, %v1287_v4  ;;  %v597_v58 = vmax.f32 %v589_v51, %v593_v54 }
 0x215   :  { %v1347_v59 = vadd.f32 %v599_v56, %v1290_v9  ;;  %v1095_v9 = vld [vmem:[#allocation5 + $0x68] sm:$0xff]   ;;  %v606_v15 = vrot.slane %v602_v62, 7  ;;  %v622_v16 = vrot.slane %v602_v62, 1 }
 0x216   :  { %v604_v60 = vrot.slane %v1344_v57, 7  ;;  %v1351_v61 = vadd.f32 %v597_v58, %v1293_v10  ;;  %v620_v12 = vrot.slane %v1344_v57, 1 }
 0x217   :  { %v607_v63 = vrot.slane %v1347_v59, 7  ;;  %v619_v4 = vpack.c.bf16 %v1347_v59, %v602_v62  ;;  %v623_v24 = vrot.slane %v1347_v59, 1 }
 0x218   :  { %v605_v0 = vrot.slane %v1351_v61, 7  ;;  %v618_v3 = vpack.c.bf16 %v1351_v61, %v1344_v57  ;;  %v621_v14 = vrot.slane %v1351_v61, 1 }
 0x219   :  { %v611_v8 = vsel %vm55_vm1, %v607_v63, %v604_v60  ;;  %v608_v20 = vsel %vm55_vm1, %v606_v15, %v607_v63  ;;  %v627_v25 = vsel %vm74_vm3, %v623_v24, %v620_v12  ;;  %v624_v26 = vsel %vm74_vm3, %v622_v16, %v623_v24 }
 0x21a   :  { %1029 = vmatprep.mubr.msk.bf16.mxu0 %vm108_vm0, %v618_v3  ;;  %v610_v10 = vsel %vm55_vm1, %v604_v60, %v605_v0  ;;  %v612_v11 = vsel %vm60_vm2, %v611_v8, 0.0  ;;  %v609_v7 = vsel %vm55_vm1, %v605_v0, %v606_v15  ;;  %v625_v6 = vsel %vm74_vm3, %v621_v14, %v622_v16 }
 0x21b   :  { %1030 = vmatmul.mubr.msk.bf16.vlgmr.msra.gmra.mrb[4].mxu0 %vm108_vm0, %v619_v4  ;;  %v616_v13 = vpack.c.bf16 %v610_v10, %v612_v11  ;;  %v614_v17 = vsel %vm60_vm2, %v609_v7, 0.0  ;;  %v626_v18 = vsel %vm74_vm3, %v620_v12, %v621_v14  ;;  %v629_v19 = vsel %vm80_vm4, %v625_v6, 0.0 }
 0x21c   :  { %1034 = vmatpush3.bf16.msra.mxu0 %v1094_v40  ;;  %v617_v21 = vpack.c.bf16 %v608_v20, %v614_v17  ;;  %v632_v23 = vpack.c.bf16 %v629_v19, %v626_v18  ;;  %v631_v27 = vsel %vm80_vm4, %v627_v25, 0.0 }
 0x21d   :  { %1037 = vmatprep.mubr.msk.bf16.mxu0 %vm108_vm0, %v616_v13  ;;  %1035 = vmatprep.subr.bf16.mxu0 %v1095_v9  ;;  %v633_v28 = vpack.c.bf16 %v631_v27, %v624_v26 }
 0x220   :  { %1036 = vmatpush3.bf16.msra.mxu0 %v1095_v9 }
 0x221   :  { %1041 = vmatprep.subr.bf16.mxu0 %v1096_v5 }
 0x227   :  { %1038 = vmatmul.mubr.msk.bf16.vlgmr.msra.gmra.mrb[4].mxu0 %vm108_vm0, %v617_v21 }
 0x228   :  { %1042 = vmatpush3.bf16.msra.mxu0 %v1096_v5  ;;  %1045 = vmatprep.mubr.msk.bf16.mxu0 %vm108_vm0, %v632_v23 }
 0x229   :  { %1043 = vmatprep.subr.bf16.mxu0 %v1097_v22 }
 0x22c   :  { %1044 = vmatpush3.bf16.msra.mxu0 %v1097_v22 }
 0x233   :  { %1046 = vmatmul.mubr.msk.bf16.vlgmr.msra.gmra.mrb[4].mxu0 %vm108_vm0, %v633_v28 }
 0x306   :  { %v1047_v30 = vpop.f32.mrb[4].mxu0 }
 0x307   :  { %v864_v31 = vadd.f32 %v1047_v30, %v940_v29  ;;  %v835_v32 = vpop.f32.mrb[5].mxu0 }
 0x308   :  { %v862_v33 = vadd.f32 %v940_v29, %v835_v32  ;;  %v1048_v34 = vpop.f32.mrb[6].mxu0 }
 0x309   :  { %v868_v35 = vmul.f32 0.01, %v864_v31  ;;  %v865_v36 = vadd.f32 %v1048_v34, %v940_v29  ;;  %v838_v37 = vpop.f32.mrb[7].mxu0 }
 0x30a   :  { %v866_v1 = vmul.f32 0.01, %v862_v33  ;;  %v863_v38 = vadd.f32 %v940_v29, %v838_v37 }
 0x30b   :  { %v872_v39 = vmax.f32 %v864_v31, %v868_v35  ;;  %v869_v2 = vmul.f32 0.01, %v865_v36 }
 0x30c   :  { %v870_v40 = vmax.f32 %v862_v33, %v866_v1  ;;  %v867_v41 = vmul.f32 0.01, %v863_v38 }
 0x30d   :  { %v876_v42 = vadd.f32 %v872_v39, %v602_v62  ;;  %v873_v43 = vmax.f32 %v865_v36, %v869_v2 }
 0x30e   :  { %v874_v44 = vadd.f32 %v870_v40, %v1344_v57  ;;  %v871_v45 = vmax.f32 %v863_v38, %v867_v41 }
 0x30f   :  { %880 = vst.msk [vmem:[#allocation7 + $0x10] sm:$0xff] %vm108_vm0, %v876_v42  ;;  %v877_v46 = vadd.f32 %v873_v43, %v1347_v59 }
 0x310   :  { %878 = vst.msk [vmem:[#allocation7] sm:$0xff] %vm108_vm0, %v874_v44  ;;  %v875_v47 = vadd.f32 %v871_v45, %v1351_v61 }
 0x311   :  { %881 = vst.msk [vmem:[#allocation7 + $0x18] sm:$0xff] %vm108_vm0, %v877_v46 }
 0x312   :  { %879 = vst.msk [vmem:[#allocation7 + $0x8] sm:$0xff] %vm108_vm0, %v875_v47 }
 0x313   :  { %1153 = shalt.err (!%p1150_p6)
}
 0x314   :  { %s1154_s21 = scalar_lea.hbm %s1420_s3, 512 }
 0x315   :  { %p1155_p7 = scmp.ne.s32.totalorder %s1420_s3, %s1154_s21  ;;  %p1158_p8 = scmp.lt.u32.totalorder %s1154_s21, %s1420_s3 }
 0x317   :  { %p1160_p9 = pnand %p1158_p8, %p1155_p7 }
 0x319   :  { %1163 = shalt.err (!%p1160_p9)
}
 0x31a   :  { %893 = dma.vmem_to_hbm [thread:$0]  %s888_s18, 512, %s1420_s3, [#allocation4], %s1171_s22, %s1171_s22, %s1172_s23  }
 0x31b   :  { %1168 = dma.done.wait [#allocation4], 512  }
 0x31c   :  { %1169 = vsyncadd [#allocation4], 4294966784 }
 0x31d   :  { %897 = vsyncpa [#allocation3], 1 }
 0x31e   :  { %898 = vsyncpa [#allocation6], 1 }
 0x31f   :  { %899 = vsyncpa [#allocation4], 1 }

// kernel: _convresnet_call.1
= control target key start
LH: loop header
LB: loop body
LE: loop exit
PB: predicated region body
PF: predicated region fallthrough
CT: control target
= control target key end

     0   :  { %8 = vsyncpa [#allocation3], 0  ;;  %s1417_s0 = inlined_call_operand.hbm [shape: f32[2,16,32], index: 0, kind: input, shape index: {}]   ;;  %s1418_s1 = inlined_call_operand.hbm [shape: bf16[3,3,32,32], index: 1, kind: input, shape index: {}]   ;;  %s1419_s2 = inlined_call_operand.vmem [shape: f32[3,1,32], index: 2, kind: input, shape index: {}]   ;;  %s1420_s3 = inlined_call_operand.hbm [shape: f32[2,16,32], index: 3, kind: output, shape index: {}]  }
   0x1   :  { %9 = vsyncpa [#allocation6], 0 }
   0x2   :  { %10 = vsyncpa [#allocation4], 0  ;;  %s1170_s12 = smov [#allocation2]   ;;  %s1098_s16 = scalar_lea.hbm %s1417_s0, 512 }
   0x3   :  { %s16_s13 = sshll.u32 %s1170_s12, 4  ;;  %p1099_p0 = scmp.ne.s32.totalorder %s1417_s0, %s1098_s16  ;;  %s17_s13 = int_to_ptr.vmem [resolvable:$true] %s16_s13 }
   0x4   :  { %p1102_p1 = scmp.lt.u32.totalorder %s1098_s16, %s1417_s0 }
   0x6   :  { %p1104_p2 = pnand %p1102_p1, %p1099_p0 }
   0x8   :  { %1107 = shalt.err (!%p1104_p2)
}
   0x9   :  { %s1108_s21 = scalar_lea.vmem %s17_s13, 512  ;;  %p1113_p4 = scmp.lt.s32.totalorder %s17_s13, %s17_s13 }
   0xa   :  { %p1109_p3 = scmp.ne.s32.totalorder %s17_s13, %s1108_s21  ;;  %p1114_p5 = scmp.lt.s32.totalorder %s1108_s21, %s1108_s21 }
   0xc   :  { %p1115_p6 = por %p1114_p5, %p1113_p4 }
   0xe   :  { %p1116_p7 = pnand %p1115_p6, %p1109_p3 }
  0x10   :  { %1119 = shalt.err (!%p1116_p7)
}
  0x11   :  { %s1171_s22 = smov 128   ;;  %s1172_s23 = smov 8  }
  0x12   :  { %22 = dma.hbm_to_vmem [thread:$0]  %s1417_s0, 512, %s17_s13, [#allocation3], %s1171_s22, %s1171_s22, %s1172_s23  }
  0x13   :  { %s1173_s26 = smov [#allocation5]   ;;  %s1120_s30 = scalar_lea.hbm %s1418_s1, 2304 }
  0x14   :  { %s28_s27 = sshll.u32 %s1173_s26, 4  ;;  %p1121_p8 = scmp.ne.s32.totalorder %s1418_s1, %s1120_s30  ;;  %s29_s27 = int_to_ptr.vmem [resolvable:$true] %s28_s27 }
  0x15   :  { %p1124_p9 = scmp.lt.u32.totalorder %s1120_s30, %s1418_s1 }
  0x17   :  { %p1126_p10 = pnand %p1124_p9, %p1121_p8 }
  0x19   :  { %1129 = shalt.err (!%p1126_p10)
}
  0x1a   :  { %s1130_s8 = scalar_lea.vmem %s29_s27, 2304  ;;  %p1135_p12 = scmp.lt.s32.totalorder %s29_s27, %s29_s27 }
  0x1b   :  { %p1131_p11 = scmp.ne.s32.totalorder %s29_s27, %s1130_s8  ;;  %p1136_p13 = scmp.lt.s32.totalorder %s1130_s8, %s1130_s8 }
  0x1d   :  { %p1137_p0 = por %p1136_p13, %p1135_p12 }
  0x1f   :  { %p1138_p1 = pnand %p1137_p0, %p1131_p11 }
  0x21   :  { %1141 = shalt.err (!%p1138_p1)
}
  0x22   :  { %s1174_s0 = smov 64   ;;  %s1175_s9 = smov 4  }
  0x23   :  { %34 = dma.hbm_to_vmem [thread:$0]  %s1418_s1, 2304, %s29_s27, [#allocation6], %s1174_s0, %s1174_s0, %s1175_s9  }
  0x24   :  { %1164 = dma.done.wait [#allocation3], 512  }
  0x25   :  { %1165 = vsyncadd [#allocation3], 4294966784 }
  0x26   :  { %1166 = dma.done.wait [#allocation6], 2304  }
  0x27   :  { %1167 = vsyncadd [#allocation6], 4294964992  ;;  %v44_v0 = vlaneseq  ;;  %v1080_v3 = vld [vmem:[#allocation5] sm:$0xff]   ;;  %vm108_vm0 = vcmask 261120   ;;  %v1081_v4 = vld [vmem:[#allocation5 + $0x8] sm:$0xff]   ;;  %s1176_s17 = smov [#allocation7]  }
  0x28   :  { %985 = vmatprep.subr.bf16.mxu0 %v1080_v3  ;;  %v1230_v5 = vld [vmem:[#allocation2] sm:$0xff]  ;;  %v1232_v6 = vld [vmem:[#allocation2 + $0x8] sm:$0xff]  ;;  %v1234_v7 = vld [vmem:[#allocation2 + $0x18] sm:$0xff]  ;;  %s887_s18 = sshll.u32 %s1176_s17, 4  ;;  %s888_s18 = int_to_ptr.vmem [resolvable:$true] %s887_s18 }
  0x29   :  { %v1224_v1 = vshrl.u32 %v44_v0, 7  ;;  %986 = vmatpush3.bf16.msra.mxu0 %v1080_v3  ;;  %v51_v8 = vrot.slane %v1230_v5, 7  ;;  %v52_v9 = vrot.slane %v1232_v6, 7  ;;  %v54_v10 = vrot.slane %v1234_v7, 7  ;;  %v1243_v12 = vld [vmem:[#allocation2 + $0x10] sm:$0xff]  ;;  %v1082_v13 = vld [vmem:[#allocation5 + $0x20] sm:$0xff]   ;;  %p1147_p3 = scmp.lt.s32.totalorder %s888_s18, %s888_s18 }
  0x2a   :  { %v73_v11 = vrot.slane %v1234_v7, 1  ;;  %987 = vmatprep.subr.bf16.mxu0 %v1081_v4  ;;  %v53_v14 = vrot.slane %v1243_v12, 7  ;;  %v1083_v15 = vld [vmem:[#allocation5 + $0x10] sm:$0xff]   ;;  %v68_v16 = vpack.c.bf16 %v1232_v6, %v1230_v5  ;;  %v1084_v22 = vld [vmem:[#allocation5 + $0x18] sm:$0xff]   ;;  %v70_v25 = vrot.slane %v1230_v5, 1  ;;  %v1085_v28 = vld [vmem:[#allocation5 + $0x28] sm:$0xff]  }
  0x2b   :  { %v1227_v2 = vadd.s32 8, %v1224_v1  ;;  %vm55_vm1 = vcmp.lt.s32.totalorder %v1224_v1, 1  ;;  %vm60_vm2 = vcmp.ge.s32.totalorder %v1224_v1, 1  ;;  %vm74_vm3 = vcmp.lt.s32.totalorder %v1224_v1, 7  ;;  %977 = vmatprep.subr.bf16.mxu1 %v1083_v15  ;;  %v1086_v39 = vld [vmem:[#allocation5 + $0x40] sm:$0xff]   ;;  %v1087_v40 = vld [vmem:[#allocation5 + $0x48] sm:$0xff]  }
  0x2c   :  { %v58_v17 = vsel %vm55_vm1, %v51_v8, %v52_v9  ;;  %v59_v18 = vsel %vm55_vm1, %v54_v10, %v51_v8  ;;  %v56_v20 = vsel %vm55_vm1, %v53_v14, %v54_v10  ;;  %v57_v21 = vsel %vm55_vm1, %v52_v9, %v53_v14  ;;  %981 = vmatprep.mubr.msk.bf16.mxu1 %vm108_vm0, %v68_v16  ;;  %v1088_v41 = vld [vmem:[#allocation5 + $0x30] sm:$0xff]   ;;  %v912_v47 = vld [vmem:[%s1419_s2] ss:$0 sm:$0xff] }
  0x2d   :  { %vm80_vm4 = vcmp.lt.s32.totalorder %v1227_v2, 15  ;;  %v62_v19 = vsel %vm60_vm2, %v59_v18, 0.0  ;;  %988 = vmatpush3.bf16.msra.mxu0 %v1081_v4  ;;  %v64_v24 = vsel %vm60_vm2, %v57_v21, 0.0  ;;  %978 = vmatpush3.bf16.msra.mxu1 %v1083_v15  ;;  %v71_v26 = vrot.slane %v1232_v6, 1  ;;  %v1090_v21 = vld [vmem:[#allocation5 + $0x50] sm:$0xff]  }
  0x2e   :  { %v66_v23 = vpack.c.bf16 %v58_v17, %v62_v19  ;;  %v67_v27 = vpack.c.bf16 %v56_v20, %v64_v24  ;;  %993 = vmatprep.subr.bf16.mxu0 %v1082_v13  ;;  %979 = vmatprep.subr.bf16.mxu1 %v1084_v22  ;;  %v72_v29 = vrot.slane %v1243_v12, 1  ;;  %v78_v31 = vsel %vm74_vm3, %v73_v11, %v70_v25 }
  0x2f   :  { %v77_v30 = vsel %vm74_vm3, %v70_v25, %v71_v26  ;;  %v69_v32 = vpack.c.bf16 %v1234_v7, %v1243_v12  ;;  %v84_v35 = vsel %vm80_vm4, %v78_v31, 0.0  ;;  %v1091_v31 = vld [vmem:[#allocation5 + $0x58] sm:$0xff]  }
  0x30   :  { %989 = vmatprep.mubr.msk.bf16.mxu0 %vm108_vm0, %v66_v23  ;;  %v76_v33 = vsel %vm74_vm3, %v71_v26, %v72_v29  ;;  %v75_v37 = vsel %vm74_vm3, %v72_v29, %v73_v11 }
  0x31   :  { %990 = vmatmul.mubr.msk.bf16.vlgmr.msra.gmra.mrb[0].mxu0 %vm108_vm0, %v67_v27  ;;  %980 = vmatpush3.bf16.msra.mxu1 %v1084_v22  ;;  %v82_v34 = vsel %vm80_vm4, %v76_v33, 0.0  ;;  %v86_v38 = vpack.c.bf16 %v84_v35, %v75_v37 }
  0x32   :  { %994 = vmatpush3.bf16.msra.mxu0 %v1082_v13  ;;  %v85_v36 = vpack.c.bf16 %v82_v34, %v77_v30  ;;  %1001 = vmatprep.subr.bf16.mxu1 %v1086_v39 }
  0x33   :  { %995 = vmatprep.subr.bf16.mxu0 %v1085_v28 }
  0x34   :  { %982 = vmatmul.mubr.msk.bf16.vlgmr.msra.gmra.mrb[0].mxu1 %vm108_vm0, %v69_v32  ;;  %997 = vmatprep.mubr.msk.bf16.mxu0 %vm108_vm0, %v85_v36 }
  0x35   :  { %1002 = vmatpush3.bf16.msra.mxu1 %v1086_v39  ;;  %v1093_v39 = vld [vmem:[#allocation5 + $0x78] sm:$0xff]  }
  0x36   :  { %996 = vmatpush3.bf16.msra.mxu0 %v1085_v28  ;;  %1003 = vmatprep.subr.bf16.mxu1 %v1087_v40 }
  0x39   :  { %1004 = vmatpush3.bf16.msra.mxu1 %v1087_v40  ;;  %v1094_v40 = vld [vmem:[#allocation5 + $0x60] sm:$0xff]  }
  0x3a   :  { %1009 = vmatprep.subr.bf16.mxu1 %v1088_v41 }
  0x3d   :  { %998 = vmatmul.mubr.msk.bf16.vlgmr.msra.gmra.mrb[0].mxu0 %vm108_vm0, %v86_v38  ;;  %v1092_v38 = vld [vmem:[#allocation5 + $0x70] sm:$0xff]  }
  0x3e   :  { %1025 = vmatprep.subr.bf16.mxu0 %v1092_v38 }
  0x3f   :  { %1026 = vmatpush3.bf16.msra.mxu0 %v1092_v38 }
  0x40   :  { %1027 = vmatprep.subr.bf16.mxu0 %v1093_v39 }
  0x43   :  { %1028 = vmatpush3.bf16.msra.mxu0 %v1093_v39 }
  0x44   :  { %1033 = vmatprep.subr.bf16.mxu0 %v1094_v40 }
 0x107   :  { %v983_v42 = vpop.f32.mrb[0].mxu1 }
 0x108   :  { %v149_v43 = vpop.f32.mrb[1].mxu1 }
 0x109   :  { %v984_v44 = vpop.f32.mrb[2].mxu1 }
 0x10a   :  { %v152_v45 = vpop.f32.mrb[3].mxu1 }
 0x110   :  { %v999_v46 = vpop.f32.mrb[0].mxu0 }
 0x111   :  { %v1049_v48 = vadd.f32 %v999_v46, %v983_v42  ;;  %v288_v49 = vpop.f32.mrb[1].mxu0 }
 0x112   :  { %v1050_v50 = vadd.f32 %v288_v49, %v149_v43  ;;  %v1000_v51 = vpop.f32.mrb[2].mxu0 }
 0x113   :  { %v316_v52 = vadd.f32 %v1049_v48, %v912_v47  ;;  %v1051_v53 = vadd.f32 %v1000_v51, %v984_v44  ;;  %v291_v54 = vpop.f32.mrb[3].mxu0 }
 0x114   :  { %v314_v55 = vadd.f32 %v1050_v50, %v912_v47  ;;  %v1052_v56 = vadd.f32 %v291_v54, %v152_v45 }
 0x115   :  { %v320_v57 = vmul.f32 0.01, %v316_v52  ;;  %v317_v58 = vadd.f32 %v1051_v53, %v912_v47 }
 0x116   :  { %v318_v59 = vmul.f32 0.01, %v314_v55  ;;  %v315_v60 = vadd.f32 %v1052_v56, %v912_v47 }
 0x117   :  { %v321_v61 = vmul.f32 0.01, %v317_v58  ;;  %v324_v0 = vmax.f32 %v316_v52, %v320_v57 }
 0x118   :  { %v322_v62 = vmax.f32 %v314_v55, %v318_v59  ;;  %v319_v63 = vmul.f32 0.01, %v315_v60 }
 0x119   :  { %v325_v3 = vmax.f32 %v317_v58, %v321_v61  ;;  %v1297_v13 = vadd.f32 %v324_v0, %v1243_v12 }
 0x11a   :  { %v1287_v4 = vadd.f32 %v322_v62, %v1230_v5  ;;  %v323_v8 = vmax.f32 %v315_v60, %v319_v63 }
 0x11b   :  { %v1290_v9 = vadd.f32 %v325_v3, %v1234_v7  ;;  %v332_v20 = vrot.slane %v1297_v13, 7  ;;  %v348_v22 = vrot.slane %v1297_v13, 1 }
 0x11c   :  { %v1293_v10 = vadd.f32 %v323_v8, %v1232_v6  ;;  %v330_v11 = vrot.slane %v1287_v4, 7  ;;  %v1089_v6 = vld [vmem:[#allocation5 + $0x38] sm:$0xff]   ;;  %v346_v25 = vrot.slane %v1287_v4, 1 }
 0x11d   :  { %v333_v14 = vrot.slane %v1290_v9, 7  ;;  %v345_v16 = vpack.c.bf16 %v1290_v9, %v1297_v13  ;;  %v349_v33 = vrot.slane %v1290_v9, 1 }
 0x11e   :  { %v344_v15 = vpack.c.bf16 %v1293_v10, %v1287_v4  ;;  %v331_v5 = vrot.slane %v1293_v10, 7  ;;  %v347_v19 = vrot.slane %v1293_v10, 1 }
 0x11f   :  { %v337_v7 = vsel %vm55_vm1, %v333_v14, %v330_v11  ;;  %v334_v29 = vsel %vm55_vm1, %v332_v20, %v333_v14  ;;  %v353_v34 = vsel %vm74_vm3, %v349_v33, %v346_v25  ;;  %v350_v35 = vsel %vm74_vm3, %v348_v22, %v349_v33 }
 0x120   :  { %1005 = vmatprep.mubr.msk.bf16.mxu1 %vm108_vm0, %v344_v15  ;;  %v336_v12 = vsel %vm55_vm1, %v330_v11, %v331_v5  ;;  %v338_v17 = vsel %vm60_vm2, %v337_v7, 0.0  ;;  %v335_v23 = vsel %vm55_vm1, %v331_v5, %v332_v20  ;;  %v351_v24 = vsel %vm74_vm3, %v347_v19, %v348_v22  ;;  %v1096_v5 = vld [vmem:[#allocation5 + $0x80] sm:$0xff]   ;;  %v1097_v22 = vld [vmem:[#allocation5 + $0x88] sm:$0xff]  }
 0x121   :  { %1006 = vmatmul.mubr.msk.bf16.vlgmr.msra.gmra.mrb[4].mxu1 %vm108_vm0, %v345_v16  ;;  %v342_v18 = vpack.c.bf16 %v336_v12, %v338_v17  ;;  %v340_v26 = vsel %vm60_vm2, %v335_v23, 0.0  ;;  %v352_v27 = vsel %vm74_vm3, %v346_v25, %v347_v19  ;;  %v355_v28 = vsel %vm80_vm4, %v351_v24, 0.0 }
 0x122   :  { %1010 = vmatpush3.bf16.msra.mxu1 %v1088_v41  ;;  %v343_v30 = vpack.c.bf16 %v334_v29, %v340_v26  ;;  %v358_v32 = vpack.c.bf16 %v355_v28, %v352_v27  ;;  %v357_v36 = vsel %vm80_vm4, %v353_v34, 0.0  ;;  %v926_v41 = vld [vmem:[%s1419_s2 + $0x1] ss:$0 sm:$0xff]  ;;  %v940_v29 = vld [vmem:[%s1419_s2 + $0x2] ss:$0 sm:$0xff]  ;;  %s1142_s2 = scalar_lea.vmem %s888_s18, 512 }
 0x123   :  { %1013 = vmatprep.mubr.msk.bf16.mxu1 %vm108_vm0, %v342_v18  ;;  %1011 = vmatprep.subr.bf16.mxu1 %v1089_v6  ;;  %v359_v37 = vpack.c.bf16 %v357_v36, %v350_v35  ;;  %p1143_p2 = scmp.ne.s32.totalorder %s888_s18, %s1142_s2  ;;  %p1148_p4 = scmp.lt.s32.totalorder %s1142_s2, %s1142_s2 }
 0x125   :  { %p1149_p5 = por %p1148_p4, %p1147_p3 }
 0x126   :  { %1012 = vmatpush3.bf16.msra.mxu1 %v1089_v6 }
 0x127   :  { %1017 = vmatprep.subr.bf16.mxu1 %v1090_v21  ;;  %p1150_p6 = pnand %p1149_p5, %p1143_p2 }
 0x12d   :  { %1014 = vmatmul.mubr.msk.bf16.vlgmr.msra.gmra.mrb[4].mxu1 %vm108_vm0, %v343_v30 }
 0x12e   :  { %1018 = vmatpush3.bf16.msra.mxu1 %v1090_v21  ;;  %1021 = vmatprep.mubr.msk.bf16.mxu1 %vm108_vm0, %v358_v32 }
 0x12f   :  { %1019 = vmatprep.subr.bf16.mxu1 %v1091_v31 }
 0x132   :  { %1020 = vmatpush3.bf16.msra.mxu1 %v1091_v31 }
 0x139   :  { %1022 = vmatmul.mubr.msk.bf16.vlgmr.msra.gmra.mrb[4].mxu1 %vm108_vm0, %v359_v37 }
 0x20c   :  { %v1023_v42 = vpop.f32.mrb[4].mxu1 }
 0x20d   :  { %v590_v43 = vadd.f32 %v1023_v42, %v926_v41  ;;  %v561_v44 = vpop.f32.mrb[5].mxu1 }
 0x20e   :  { %v588_v45 = vadd.f32 %v926_v41, %v561_v44  ;;  %v1024_v46 = vpop.f32.mrb[6].mxu1 }
 0x20f   :  { %v594_v47 = vmul.f32 0.01, %v590_v43  ;;  %v591_v48 = vadd.f32 %v1024_v46, %v926_v41  ;;  %v564_v49 = vpop.f32.mrb[7].mxu1 }
 0x210   :  { %v592_v50 = vmul.f32 0.01, %v588_v45  ;;  %v589_v51 = vadd.f32 %v926_v41, %v564_v49 }
 0x211   :  { %v595_v52 = vmul.f32 0.01, %v591_v48  ;;  %v598_v55 = vmax.f32 %v590_v43, %v594_v47 }
 0x212   :  { %v596_v53 = vmax.f32 %v588_v45, %v592_v50  ;;  %v593_v54 = vmul.f32 0.01, %v589_v51 }
 0x213   :  { %v599_v56 = vmax.f32 %v591_v48, %v595_v52  ;;  %v602_v62 = vadd.f32 %v598_v55, %v1297_v13 }
 0x214   :  { %v1344_v57 = vadd.f32 %v596_v53, %v1287_v4  ;;  %v597_v58 = vmax.f32 %v589_v51, %v593_v54 }
 0x215   :  { %v1347_v59 = vadd.f32 %v599_v56, %v1290_v9  ;;  %v1095_v9 = vld [vmem:[#allocation5 + $0x68] sm:$0xff]   ;;  %v606_v15 = vrot.slane %v602_v62, 7  ;;  %v622_v16 = vrot.slane %v602_v62, 1 }
 0x216   :  { %v604_v60 = vrot.slane %v1344_v57, 7  ;;  %v1351_v61 = vadd.f32 %v597_v58, %v1293_v10  ;;  %v620_v12 = vrot.slane %v1344_v57, 1 }
 0x217   :  { %v607_v63 = vrot.slane %v1347_v59, 7  ;;  %v619_v4 = vpack.c.bf16 %v1347_v59, %v602_v62  ;;  %v623_v24 = vrot.slane %v1347_v59, 1 }
 0x218   :  { %v605_v0 = vrot.slane %v1351_v61, 7  ;;  %v618_v3 = vpack.c.bf16 %v1351_v61, %v1344_v57  ;;  %v621_v14 = vrot.slane %v1351_v61, 1 }
 0x219   :  { %v611_v8 = vsel %vm55_vm1, %v607_v63, %v604_v60  ;;  %v608_v20 = vsel %vm55_vm1, %v606_v15, %v607_v63  ;;  %v627_v25 = vsel %vm74_vm3, %v623_v24, %v620_v12  ;;  %v624_v26 = vsel %vm74_vm3, %v622_v16, %v623_v24 }
 0x21a   :  { %1029 = vmatprep.mubr.msk.bf16.mxu0 %vm108_vm0, %v618_v3  ;;  %v610_v10 = vsel %vm55_vm1, %v604_v60, %v605_v0  ;;  %v612_v11 = vsel %vm60_vm2, %v611_v8, 0.0  ;;  %v609_v7 = vsel %vm55_vm1, %v605_v0, %v606_v15  ;;  %v625_v6 = vsel %vm74_vm3, %v621_v14, %v622_v16 }
 0x21b   :  { %1030 = vmatmul.mubr.msk.bf16.vlgmr.msra.gmra.mrb[4].mxu0 %vm108_vm0, %v619_v4  ;;  %v616_v13 = vpack.c.bf16 %v610_v10, %v612_v11  ;;  %v614_v17 = vsel %vm60_vm2, %v609_v7, 0.0  ;;  %v626_v18 = vsel %vm74_vm3, %v620_v12, %v621_v14  ;;  %v629_v19 = vsel %vm80_vm4, %v625_v6, 0.0 }
 0x21c   :  { %1034 = vmatpush3.bf16.msra.mxu0 %v1094_v40  ;;  %v617_v21 = vpack.c.bf16 %v608_v20, %v614_v17  ;;  %v632_v23 = vpack.c.bf16 %v629_v19, %v626_v18  ;;  %v631_v27 = vsel %vm80_vm4, %v627_v25, 0.0 }
 0x21d   :  { %1037 = vmatprep.mubr.msk.bf16.mxu0 %vm108_vm0, %v616_v13  ;;  %1035 = vmatprep.subr.bf16.mxu0 %v1095_v9  ;;  %v633_v28 = vpack.c.bf16 %v631_v27, %v624_v26 }
 0x220   :  { %1036 = vmatpush3.bf16.msra.mxu0 %v1095_v9 }
 0x221   :  { %1041 = vmatprep.subr.bf16.mxu0 %v1096_v5 }
 0x227   :  { %1038 = vmatmul.mubr.msk.bf16.vlgmr.msra.gmra.mrb[4].mxu0 %vm108_vm0, %v617_v21 }
 0x228   :  { %1042 = vmatpush3.bf16.msra.mxu0 %v1096_v5  ;;  %1045 = vmatprep.mubr.msk.bf16.mxu0 %vm108_vm0, %v632_v23 }
 0x229   :  { %1043 = vmatprep.subr.bf16.mxu0 %v1097_v22 }
 0x22c   :  { %1044 = vmatpush3.bf16.msra.mxu0 %v1097_v22 }
 0x233   :  { %1046 = vmatmul.mubr.msk.bf16.vlgmr.msra.gmra.mrb[4].mxu0 %vm108_vm0, %v633_v28 }
 0x306   :  { %v1047_v30 = vpop.f32.mrb[4].mxu0 }
 0x307   :  { %v864_v31 = vadd.f32 %v1047_v30, %v940_v29  ;;  %v835_v32 = vpop.f32.mrb[5].mxu0 }
 0x308   :  { %v862_v33 = vadd.f32 %v940_v29, %v835_v32  ;;  %v1048_v34 = vpop.f32.mrb[6].mxu0 }
 0x309   :  { %v868_v35 = vmul.f32 0.01, %v864_v31  ;;  %v865_v36 = vadd.f32 %v1048_v34, %v940_v29  ;;  %v838_v37 = vpop.f32.mrb[7].mxu0 }
 0x30a   :  { %v866_v1 = vmul.f32 0.01, %v862_v33  ;;  %v863_v38 = vadd.f32 %v940_v29, %v838_v37 }
 0x30b   :  { %v872_v39 = vmax.f32 %v864_v31, %v868_v35  ;;  %v869_v2 = vmul.f32 0.01, %v865_v36 }
 0x30c   :  { %v870_v40 = vmax.f32 %v862_v33, %v866_v1  ;;  %v867_v41 = vmul.f32 0.01, %v863_v38 }
 0x30d   :  { %v876_v42 = vadd.f32 %v872_v39, %v602_v62  ;;  %v873_v43 = vmax.f32 %v865_v36, %v869_v2 }
 0x30e   :  { %v874_v44 = vadd.f32 %v870_v40, %v1344_v57  ;;  %v871_v45 = vmax.f32 %v863_v38, %v867_v41 }
 0x30f   :  { %880 = vst.msk [vmem:[#allocation7 + $0x10] sm:$0xff] %vm108_vm0, %v876_v42  ;;  %v877_v46 = vadd.f32 %v873_v43, %v1347_v59 }
 0x310   :  { %878 = vst.msk [vmem:[#allocation7] sm:$0xff] %vm108_vm0, %v874_v44  ;;  %v875_v47 = vadd.f32 %v871_v45, %v1351_v61 }
 0x311   :  { %881 = vst.msk [vmem:[#allocation7 + $0x18] sm:$0xff] %vm108_vm0, %v877_v46 }
 0x312   :  { %879 = vst.msk [vmem:[#allocation7 + $0x8] sm:$0xff] %vm108_vm0, %v875_v47 }
 0x313   :  { %1153 = shalt.err (!%p1150_p6)
}
 0x314   :  { %s1154_s21 = scalar_lea.hbm %s1420_s3, 512 }
 0x315   :  { %p1155_p7 = scmp.ne.s32.totalorder %s1420_s3, %s1154_s21  ;;  %p1158_p8 = scmp.lt.u32.totalorder %s1154_s21, %s1420_s3 }
 0x317   :  { %p1160_p9 = pnand %p1158_p8, %p1155_p7 }
 0x319   :  { %1163 = shalt.err (!%p1160_p9)
}
 0x31a   :  { %893 = dma.vmem_to_hbm [thread:$0]  %s888_s18, 512, %s1420_s3, [#allocation4], %s1171_s22, %s1171_s22, %s1172_s23  }
 0x31b   :  { %1168 = dma.done.wait [#allocation4], 512  }
 0x31c   :  { %1169 = vsyncadd [#allocation4], 4294966784 }
 0x31d   :  { %897 = vsyncpa [#allocation3], 1 }
 0x31e   :  { %898 = vsyncpa [#allocation6], 1 }
 0x31f   :  { %899 = vsyncpa [#allocation4], 1 }

</bundles_post_ra>
